<compile_context>
chip_gen: v6e
topology: v6e:2x2x1
jax: 0.10.0
libtpu: 0.0.40
codegen_flags: <defaults>
</compile_context>

<pallas_src>
import functools
import math

import jax
import jax.numpy as jnp
from jax.experimental import pallas as pl
from jax.experimental.pallas import tpu as pltpu


# ----------------------------- helpers ---------------------------------------

def _round_up(x, m):
    return (x + m - 1) // m * m


def _pick_tile(padded_dim, candidates):
    for c in candidates:
        if c <= padded_dim and padded_dim % c == 0:
            return c
    return padded_dim


def _layernorm_f32(x, g, b, eps):
    mean = jnp.mean(x, axis=-1, keepdims=True)
    xc = x - mean
    var = jnp.mean(xc * xc, axis=-1, keepdims=True)
    return xc * jax.lax.rsqrt(var + eps) * g + b


def _gelu_tanh(y):
    c = 0.7978845608028654  # sqrt(2/pi)
    return 0.5 * y * (1.0 + jnp.tanh(c * (y + 0.044715 * y * y * y)))


# ----------------------------- tiled linear kernel ----------------------------
# Generic MXU linear (used for the patch embedding; kept as the production-size
# path).  f32 output block is resident across the K ("arbitrary") axis and is
# accumulated into directly (no VMEM scratch).

def _linear_kernel(x_ref, w_ref, b_ref, o_ref):
    kk = pl.program_id(2)

    @pl.when(kk == 0)
    def _init():
        o_ref[...] = jnp.zeros_like(o_ref)

    o_ref[...] += jnp.dot(x_ref[...], w_ref[...],
                          preferred_element_type=jnp.float32)

    @pl.when(kk == pl.num_programs(2) - 1)
    def _finalize():
        o_ref[...] += b_ref[...]


def pallas_linear(x, w_pad, b_pad, n_out):
    """y = x @ W + b.  x:(M,K) any float dtype, w_pad:(Kp,Np) bf16 pre-padded,
    b_pad:(1,Np) f32 pre-padded, n_out = logical N.  Returns (M, n_out) f32."""
    m, k = x.shape
    kp_, np_ = w_pad.shape
    mp = _round_up(m, 8)

    tm = _pick_tile(mp, (256, 128, 64, 32, 16, 8))
    tn = _pick_tile(np_, (512, 256, 128))
    tk = _pick_tile(kp_, (1024, 512, 256, 128))

    xp = jnp.pad(x.astype(jnp.bfloat16), ((0, mp - m), (0, kp_ - k)))

    out = pl.pallas_call(
        _linear_kernel,
        out_shape=jax.ShapeDtypeStruct((mp, np_), jnp.float32),
        grid=(mp // tm, np_ // tn, kp_ // tk),
        in_specs=[
            pl.BlockSpec((tm, tk), lambda i, j, kk: (i, kk)),
            pl.BlockSpec((tk, tn), lambda i, j, kk: (kk, j)),
            pl.BlockSpec((1, tn), lambda i, j, kk: (0, j)),
        ],
        out_specs=pl.BlockSpec((tm, tn), lambda i, j, kk: (i, j)),
        compiler_params=pltpu.CompilerParams(
            dimension_semantics=("parallel", "parallel", "arbitrary")),
    )(xp, w_pad, b_pad)
    return out[:m, :n_out]


# ----------------------------- fused encoder-layer kernel ---------------------

def _encoder_layer_kernel(z_ref, ln1_g_ref, ln1_b_ref, qkv_w_ref, qkv_b_ref,
                          out_w_ref, out_b_ref, ln2_g_ref, ln2_b_ref,
                          fc1_w_ref, fc1_b_ref, fc2_w_ref, fc2_b_ref, o_ref,
                          *, batch, sp, s_valid, heads, hd, eps, scale):
    e = heads * hd
    z = z_ref[...]                                           # (B*Sp, E) f32

    # ---- self-attention block (pre-norm) ----
    x = _layernorm_f32(z, ln1_g_ref[...], ln1_b_ref[...], eps)
    qkv = jnp.dot(x.astype(jnp.bfloat16), qkv_w_ref[...],
                  preferred_element_type=jnp.float32) + qkv_b_ref[...]
    qkv = qkv.astype(jnp.bfloat16)
    q = qkv[:, :e]
    k = qkv[:, e:2 * e]
    v = qkv[:, 2 * e:3 * e]

    batch_out = []
    for b in range(batch):                      # static loops: B*H tiny matmuls
        r0 = b * sp
        head_out = []
        for h in range(heads):
            c0 = h * hd
            qh = q[r0:r0 + sp, c0:c0 + hd]                   # (Sp, hd) bf16
            kh = k[r0:r0 + sp, c0:c0 + hd]
            vh = v[r0:r0 + sp, c0:c0 + hd]
            sc = jax.lax.dot_general(qh, kh, (((1,), (1,)), ((), ())),
                                     preferred_element_type=jnp.float32)
            sc = sc * scale                                  # (Sp, Sp) f32
            col = jax.lax.broadcasted_iota(jnp.int32, sc.shape, 1)
            sc = jnp.where(col < s_valid, sc, -1e30)         # mask padded keys
            mmax = jnp.max(sc, axis=-1, keepdims=True)
            p = jnp.exp(sc - mmax)
            denom = jnp.sum(p, axis=-1, keepdims=True)
            p = p * pl.reciprocal(denom, approx=True)        # EUP divide
            head_out.append(jnp.dot(p.astype(jnp.bfloat16), vh,
                                    preferred_element_type=jnp.float32))
        batch_out.append(jnp.concatenate(head_out, axis=-1))  # (Sp, E) lane-dense
    attn = jnp.concatenate(batch_out, axis=0)                 # (B*Sp, E) f32

    z = z + (jnp.dot(attn.astype(jnp.bfloat16), out_w_ref[...],
                     preferred_element_type=jnp.float32) + out_b_ref[...])

    # ---- MLP block (pre-norm) ----
    x2 = _layernorm_f32(z, ln2_g_ref[...], ln2_b_ref[...], eps)
    h1 = jnp.dot(x2.astype(jnp.bfloat16), fc1_w_ref[...],
                 preferred_element_type=jnp.float32) + fc1_b_ref[...]
    h1 = _gelu_tanh(h1)
    z = z + (jnp.dot(h1.astype(jnp.bfloat16), fc2_w_ref[...],
                     preferred_element_type=jnp.float32) + fc2_b_ref[...])

    o_ref[...] = z.astype(o_ref.dtype)


def pallas_encoder_layer(z, lp, *, batch, sp, s_valid, heads, hd, eps=1e-5):
    """One fused pre-norm transformer encoder layer.  z: (B*Sp, E) f32."""
    m, e = z.shape
    mlp = lp["fc1_w"].shape[1]

    def full(shape):
        return pl.BlockSpec(shape, lambda i, _nd=len(shape): (0,) * _nd)

    kernel = functools.partial(
        _encoder_layer_kernel, batch=batch, sp=sp, s_valid=s_valid,
        heads=heads, hd=hd, eps=eps, scale=1.0 / math.sqrt(hd))

    return pl.pallas_call(
        kernel,
        out_shape=jax.ShapeDtypeStruct((m, e), jnp.float32),
        grid=(1,),
        in_specs=[
            full((m, e)),                       # z
            full((1, e)), full((1, e)),         # ln1 gamma / beta
            full((e, 3 * e)), full((1, 3 * e)),  # qkv
            full((e, e)), full((1, e)),         # out-proj
            full((1, e)), full((1, e)),         # ln2 gamma / beta
            full((e, mlp)), full((1, mlp)),     # fc1
            full((mlp, e)), full((1, e)),       # fc2
        ],
        out_specs=full((m, e)),
        compiler_params=pltpu.CompilerParams(
            dimension_semantics=("arbitrary",)),
    )(z, lp["ln1_g"], lp["ln1_b"], lp["qkv_w"], lp["qkv_b"],
      lp["out_w"], lp["out_b"], lp["ln2_g"], lp["ln2_b"],
      lp["fc1_w"], lp["fc1_b"], lp["fc2_w"], lp["fc2_b"])


# ----------------------------- ViT forward ------------------------------------

def extract_patches(x_nchw, p):
    """Non-overlapping PxP patches; equals Conv2d(k=p, stride=p) im2col.
    Pure data-movement glue (bijective reshape/transpose, no duplication)."""
    b, c, h, w = x_nchw.shape
    gh, gw = h // p, w // p
    x = x_nchw.reshape(b, c, gh, p, gw, p)
    x = x.transpose(0, 2, 4, 1, 3, 5)              # (B, gh, gw, C, p, p)
    return x.reshape(b, gh * gw, c * p * p)        # features ordered (c, ph, pw)


def vit_forward(x_nchw, kparams, cfg):
    p = cfg["patch_size"]
    nh = cfg["num_heads"]
    e = cfg["embedding_dim"]
    hd = e // nh
    b = x_nchw.shape[0]

    # Patch embedding (Conv2d k=p stride=p == linear over C*P*P features).
    patches = extract_patches(x_nchw, p)                      # (B, Np, C*P*P)
    npatch, kdim = patches.shape[1], patches.shape[2]
    emb = pallas_linear(patches.reshape(b * npatch, kdim),
                        kparams["patch_w"], kparams["patch_b"],
                        n_out=e).reshape(b, npatch, e)

    tok = jnp.broadcast_to(kparams["cls_token"], (b, 1, e))
    z = jnp.concatenate([tok, emb], axis=1) + kparams["pos_emb"]   # (B, S, E)
    # TODO(synk): embedding_dropout / encoder-layer dropouts not modeled (eval).
    s = z.shape[1]
    sp = _round_up(s, 8)
    z = jnp.pad(z, ((0, 0), (0, sp - s), (0, 0))).reshape(b * sp, e)

    for lp in kparams["layers"]:
        z = pallas_encoder_layer(z, lp, batch=b, sp=sp, s_valid=s,
                                 heads=nh, hd=hd)

    cls = z.reshape(b, sp, e)[:, 0]                           # (B, E)

    # Classification head in plain XLA (per perf review: N=2 padded to 128
    # lanes in a Pallas matmul wastes ~64x MXU/store work + 2 launches).
    g, bb = kparams["head_ln_g"], kparams["head_ln_b"]
    mu = jnp.mean(cls, axis=-1, keepdims=True)
    var = jnp.mean(jnp.square(cls - mu), axis=-1, keepdims=True)
    cls = (cls - mu) * jax.lax.rsqrt(var + 1e-5) * g + bb
    return jnp.dot(cls, kparams["head_w"],
                   precision=jax.lax.Precision.HIGHEST) + kparams["head_b"]


# ----------------------------- param preparation -------------------------------
# One-time: cast weights to bf16 (pad to 128-multiples where needed), reshape
# biases / LN params to (1, N) f32.  Runs eagerly once, NOT inside jit.

def prepare_kernel_params(params):
    def wprep(w):
        k, n = w.shape
        kp_, np_ = _round_up(k, 128), _round_up(n, 128)
        return jnp.pad(w, ((0, kp_ - k), (0, np_ - n))).astype(jnp.bfloat16)

    def bprep(v):
        n = v.shape[0]
        np_ = _round_up(n, 128)
        return jnp.pad(v.astype(jnp.float32), (0, np_ - n)).reshape(1, np_)

    kp = {
        "patch_w": wprep(params["patch_w"]),
        "patch_b": bprep(params["patch_b"]),
        "cls_token": params["cls_token"].astype(jnp.float32),
        "pos_emb": params["pos_emb"].astype(jnp.float32),
        "head_ln_g": params["head_ln_g"].astype(jnp.float32),
        "head_ln_b": params["head_ln_b"].astype(jnp.float32),
        "head_w": params["head_w"].astype(jnp.float32),
        "head_b": params["head_b"].astype(jnp.float32),
        "layers": [],
    }
    for lp in params["layers"]:
        kp["layers"].append({
            "ln1_g": bprep(lp["ln1_g"]), "ln1_b": bprep(lp["ln1_b"]),
            "qkv_w": wprep(lp["qkv_w"]), "qkv_b": bprep(lp["qkv_b"]),
            "out_w": wprep(lp["out_w"]), "out_b": bprep(lp["out_b"]),
            "ln2_g": bprep(lp["ln2_g"]), "ln2_b": bprep(lp["ln2_b"]),
            "fc1_w": wprep(lp["fc1_w"]), "fc1_b": bprep(lp["fc1_b"]),
            "fc2_w": wprep(lp["fc2_w"]), "fc2_b": bprep(lp["fc2_b"]),
        })
    return kp


# ----------------------------- pure-JAX reference -------------------------------

def reference_forward(x_nchw, params, cfg):
    p = cfg["patch_size"]
    nh = cfg["num_heads"]
    e = cfg["embedding_dim"]
    hd = e // nh
    b = x_nchw.shape[0]
    hi = jax.lax.Precision.HIGHEST

    def linear(x2, w, bb):
        return jnp.dot(x2, w, precision=hi) + bb

    def layernorm(t, g, bb, eps=1e-5):
        m = jnp.mean(t, axis=-1, keepdims=True)
        v = jnp.mean(jnp.square(t - m), axis=-1, keepdims=True)
        return (t - m) * jax.lax.rsqrt(v + eps) * g + bb

    patches = extract_patches(x_nchw, p)
    npatch = patches.shape[1]
    emb = linear(patches.reshape(b * npatch, -1),
                 params["patch_w"], params["patch_b"]).reshape(b, npatch, e)
    tok = jnp.broadcast_to(params["cls_token"], (b, 1, e))
    z = jnp.concatenate([tok, emb], axis=1) + params["pos_emb"]
    s = z.shape[1]

    for lp in params["layers"]:
        x2 = layernorm(z.reshape(b * s, e), lp["ln1_g"], lp["ln1_b"])
        qkv = linear(x2, lp["qkv_w"], lp["qkv_b"]).reshape(b, s, 3 * e)
        q, k, v = jnp.split(qkv, 3, axis=-1)

        def heads(t):
            return t.reshape(b, s, nh, hd).transpose(0, 2, 1, 3)

        q, k, v = heads(q), heads(k), heads(v)
        scores = jnp.einsum("bhqd,bhkd->bhqk", q, k, precision=hi) / math.sqrt(hd)
        pr = jax.nn.softmax(scores, axis=-1)
        o = jnp.einsum("bhqk,bhkd->bhqd", pr, v, precision=hi)
        o = o.transpose(0, 2, 1, 3).reshape(b * s, e)
        z = z + linear(o, lp["out_w"], lp["out_b"]).reshape(b, s, e)

        x2 = layernorm(z.reshape(b * s, e), lp["ln2_g"], lp["ln2_b"])
        hmid = jax.nn.gelu(linear(x2, lp["fc1_w"], lp["fc1_b"]), approximate=False)
        z = z + linear(hmid, lp["fc2_w"], lp["fc2_b"]).reshape(b, s, e)

    cls = layernorm(z[:, 0], params["head_ln_g"], params["head_ln_b"])
    return linear(cls, params["head_w"], params["head_b"])


# ----------------------------- params / main ------------------------------------

def init_params(key, cfg):
    c, p, e = cfg["channels"], cfg["patch_size"], cfg["embedding_dim"]
    mlp, nl, nc = cfg["mlp_size"], cfg["transformer_layers"], cfg["num_classes"]
    npatch = (cfg["img_size"] // p) ** 2
    s = npatch + 1
    kdim = c * p * p

    keys = iter(jax.random.split(key, 16 + 10 * nl))

    def w(shape, std=0.02):
        return std * jax.random.normal(next(keys), shape, jnp.float32)

    params = {
        "patch_w": w((kdim, e)), "patch_b": w((e,), 0.01),
        "cls_token": jax.random.normal(next(keys), (1, 1, e), jnp.float32),
        "pos_emb": jax.random.normal(next(keys), (1, s, e), jnp.float32),
        "head_ln_g": jnp.ones((e,), jnp.float32),
        "head_ln_b": jnp.zeros((e,), jnp.float32),
        "head_w": w((e, nc)), "head_b": w((nc,), 0.01),
        "layers": [],
    }
    for _ in range(nl):
        params["layers"].append({
            "ln1_g": jnp.ones((e,), jnp.float32), "ln1_b": jnp.zeros((e,), jnp.float32),
            "qkv_w": w((e, 3 * e)), "qkv_b": w((3 * e,), 0.01),
            "out_w": w((e, e)), "out_b": w((e,), 0.01),
            "ln2_g": jnp.ones((e,), jnp.float32), "ln2_b": jnp.zeros((e,), jnp.float32),
            "fc1_w": w((e, mlp)), "fc1_b": w((mlp,), 0.01),
            "fc2_w": w((mlp, e)), "fc2_b": w((e,), 0.01),
        })
    return params


if __name__ == "__main__":
    # SMALL shapes consistent with the module (ViT scaled down).
    cfg = dict(img_size=32, channels=6, patch_size=16, embedding_dim=128,
               mlp_size=256, transformer_layers=2, num_heads=4, num_classes=2)
    batch = 2

    key = jax.random.PRNGKey(0)
    kx, kp = jax.random.split(key)
    x = jax.random.normal(kx, (batch, cfg["channels"], cfg["img_size"],
                               cfg["img_size"]), jnp.float32)
    params = init_params(kp, cfg)
    kparams = prepare_kernel_params(params)   # one-time bf16 cast / pad / reshape

    fwd = jax.jit(lambda xx, pp: vit_forward(xx, pp, cfg))
    out = jax.block_until_ready(fwd(x, kparams))
    assert out.shape == (batch, cfg["num_classes"]), out.shape

    ref = reference_forward(x, params, cfg)
    err = float(jnp.max(jnp.abs(out - ref)))
    assert err < 5e-2, f"max abs err {err}"

    print("KERNEL_OK")
</pallas_src>

<mosaic_0001>
module attributes {stable_mosaic.version = 11 : i64} {
  func.func @_linear_kernel(%arg0: i32, %arg1: i32, %arg2: i32, %arg3: memref<8x512xbf16, #tpu.memory_space<vmem>>, %arg4: memref<512x128xbf16, #tpu.memory_space<vmem>>, %arg5: memref<1x128xf32, #tpu.memory_space<vmem>>, %arg6: memref<8x128xf32, #tpu.memory_space<vmem>>) attributes {dimension_semantics = [#tpu.dimension_semantics<parallel>, #tpu.dimension_semantics<parallel>, #tpu.dimension_semantics<arbitrary>], iteration_bounds = array<i64: 1, 1, 3>, scalar_prefetch = 0 : i64, scratch_operands = 0 : i64, tpu.core_type = #tpu.core_type<tc>, window_params = [{transform_indices = @transform_0, window_bounds = array<i64: 8, 512>}, {transform_indices = @transform_1, window_bounds = array<i64: 512, 128>}, {transform_indices = @transform_2, window_bounds = array<i64: 1, 128>}, {transform_indices = @transform_3, window_bounds = array<i64: 8, 128>}]} {
    %c0_i32 = arith.constant 0 : i32
    %0 = arith.cmpi eq, %arg2, %c0_i32 : i32
    %1 = arith.extui %0 : i1 to i32
    %c0_i32_0 = arith.constant 0 : i32
    %2 = arith.cmpi ne, %1, %c0_i32_0 : i32
    scf.if %2 {
      %cst_9 = arith.constant 0.000000e+00 : f32
      %12 = vector.broadcast %cst_9 : f32 to vector<8x128xf32>
      %c0_10 = arith.constant 0 : index
      %c0_11 = arith.constant 0 : index
      %13 = vector.load %arg6[%c0_10, %c0_11] : memref<8x128xf32, #tpu.memory_space<vmem>>, vector<8x128xf32>
      tpu.vector_store %arg6[%c0_10, %c0_11], %12 {strides = array<i32>} : memref<8x128xf32, #tpu.memory_space<vmem>>, vector<8x128xf32>,
    } else {
    }
    %c0 = arith.constant 0 : index
    %c0_1 = arith.constant 0 : index
    %3 = vector.load %arg6[%c0, %c0_1] : memref<8x128xf32, #tpu.memory_space<vmem>>, vector<8x128xf32>
    %c0_2 = arith.constant 0 : index
    %c0_3 = arith.constant 0 : index
    %4 = vector.load %arg3[%c0_2, %c0_3] : memref<8x512xbf16, #tpu.memory_space<vmem>>, vector<8x512xbf16>
    %c0_4 = arith.constant 0 : index
    %c0_5 = arith.constant 0 : index
    %5 = vector.load %arg4[%c0_4, %c0_5] : memref<512x128xbf16, #tpu.memory_space<vmem>>, vector<512x128xbf16>
    %cst = arith.constant dense<0.000000e+00> : vector<8x128xf32>
    %6 = tpu.matmul %4, %5, %cst {dimension_numbers = #tpu.dot_dimension_numbers<[1], [0], [0], [1], [0, 0, 1, 1], [], []>} : vector<8x512xbf16>, vector<512x128xbf16>, vector<8x128xf32> -> vector<8x128xf32>
    %7 = arith.addf %3, %6 : vector<8x128xf32>
    %c0_6 = arith.constant 0 : index
    %c0_7 = arith.constant 0 : index
    %8 = vector.load %arg6[%c0_6, %c0_7] : memref<8x128xf32, #tpu.memory_space<vmem>>, vector<8x128xf32>
    tpu.vector_store %arg6[%c0_6, %c0_7], %7 {strides = array<i32>} : memref<8x128xf32, #tpu.memory_space<vmem>>, vector<8x128xf32>,
    %c2_i32 = arith.constant 2 : i32
    %9 = arith.cmpi eq, %arg2, %c2_i32 : i32
    %10 = arith.extui %9 : i1 to i32
    %c0_i32_8 = arith.constant 0 : i32
    %11 = arith.cmpi ne, %10, %c0_i32_8 : i32
    scf.if %11 {
      %c0_9 = arith.constant 0 : index
      %c0_10 = arith.constant 0 : index
      %12 = vector.load %arg6[%c0_9, %c0_10] : memref<8x128xf32, #tpu.memory_space<vmem>>, vector<8x128xf32>
      %c0_11 = arith.constant 0 : index
      %c0_12 = arith.constant 0 : index
      %13 = vector.load %arg5[%c0_11, %c0_12] : memref<1x128xf32, #tpu.memory_space<vmem>>, vector<1x128xf32>
      %14 = vector.broadcast %13 : vector<1x128xf32> to vector<8x128xf32>
      %15 = arith.addf %12, %14 : vector<8x128xf32>
      %c0_13 = arith.constant 0 : index
      %c0_14 = arith.constant 0 : index
      %16 = vector.load %arg6[%c0_13, %c0_14] : memref<8x128xf32, #tpu.memory_space<vmem>>, vector<8x128xf32>
      tpu.vector_store %arg6[%c0_13, %c0_14], %15 {strides = array<i32>} : memref<8x128xf32, #tpu.memory_space<vmem>>, vector<8x128xf32>,
    } else {
    }
    return
  }
  func.func @transform_0(%arg0: i32, %arg1: i32, %arg2: i32) -> (i32, i32) {
    %c0_i32 = arith.constant 0 : i32
    return %arg0, %arg2 : i32, i32
  }
  func.func @transform_1(%arg0: i32, %arg1: i32, %arg2: i32) -> (i32, i32) {
    %c0_i32 = arith.constant 0 : i32
    return %arg2, %arg1 : i32, i32
  }
  func.func @transform_2(%arg0: i32, %arg1: i32, %arg2: i32) -> (i32, i32) {
    %c0_i32 = arith.constant 0 : i32
    %c0_i32_0 = arith.constant 0 : i32
    return %c0_i32, %arg1 : i32, i32
  }
  func.func @transform_3(%arg0: i32, %arg1: i32, %arg2: i32) -> (i32, i32) {
    %c0_i32 = arith.constant 0 : i32
    return %arg0, %arg1 : i32, i32
  }
}

module attributes {stable_mosaic.version = 11 : i64} {
  func.func @_encoder_layer_kernel(%arg0: i32, %arg1: memref<16x128xf32, #tpu.memory_space<vmem>>, %arg2: memref<1x128xf32, #tpu.memory_space<vmem>>, %arg3: memref<1x128xf32, #tpu.memory_space<vmem>>, %arg4: memref<128x384xbf16, #tpu.memory_space<vmem>>, %arg5: memref<1x384xf32, #tpu.memory_space<vmem>>, %arg6: memref<128x128xbf16, #tpu.memory_space<vmem>>, %arg7: memref<1x128xf32, #tpu.memory_space<vmem>>, %arg8: memref<1x128xf32, #tpu.memory_space<vmem>>, %arg9: memref<1x128xf32, #tpu.memory_space<vmem>>, %arg10: memref<128x256xbf16, #tpu.memory_space<vmem>>, %arg11: memref<1x256xf32, #tpu.memory_space<vmem>>, %arg12: memref<256x128xbf16, #tpu.memory_space<vmem>>, %arg13: memref<1x128xf32, #tpu.memory_space<vmem>>, %arg14: memref<16x128xf32, #tpu.memory_space<vmem>>) attributes {dimension_semantics = [#tpu.dimension_semantics<arbitrary>], iteration_bounds = array<i64: 1>, scalar_prefetch = 0 : i64, scratch_operands = 0 : i64, tpu.core_type = #tpu.core_type<tc>, window_params = [{pipeline_mode = #tpu.pipeline_mode<synchronous>, transform_indices = @transform_0, window_bounds = array<i64: 16, 128>}, {pipeline_mode = #tpu.pipeline_mode<synchronous>, transform_indices = @transform_1, window_bounds = array<i64: 1, 128>}, {pipeline_mode = #tpu.pipeline_mode<synchronous>, transform_indices = @transform_2, window_bounds = array<i64: 1, 128>}, {pipeline_mode = #tpu.pipeline_mode<synchronous>, transform_indices = @transform_3, window_bounds = array<i64: 128, 384>}, {pipeline_mode = #tpu.pipeline_mode<synchronous>, transform_indices = @transform_4, window_bounds = array<i64: 1, 384>}, {pipeline_mode = #tpu.pipeline_mode<synchronous>, transform_indices = @transform_5, window_bounds = array<i64: 128, 128>}, {pipeline_mode = #tpu.pipeline_mode<synchronous>, transform_indices = @transform_6, window_bounds = array<i64: 1, 128>}, {pipeline_mode = #tpu.pipeline_mode<synchronous>, transform_indices = @transform_7, window_bounds = array<i64: 1, 128>}, {pipeline_mode = #tpu.pipeline_mode<synchronous>, transform_indices = @transform_8, window_bounds = array<i64: 1, 128>}, {pipeline_mode = #tpu.pipeline_mode<synchronous>, transform_indices = @transform_9, window_bounds = array<i64: 128, 256>}, {pipeline_mode = #tpu.pipeline_mode<synchronous>, transform_indices = @transform_10, window_bounds = array<i64: 1, 256>}, {pipeline_mode = #tpu.pipeline_mode<synchronous>, transform_indices = @transform_11, window_bounds = array<i64: 256, 128>}, {pipeline_mode = #tpu.pipeline_mode<synchronous>, transform_indices = @transform_12, window_bounds = array<i64: 1, 128>}, {pipeline_mode = #tpu.pipeline_mode<synchronous>, transform_indices = @transform_13, window_bounds = array<i64: 16, 128>}]} {
    %c0 = arith.constant 0 : index
    %c0_0 = arith.constant 0 : index
    %0 = vector.load %arg1[%c0, %c0_0] : memref<16x128xf32, #tpu.memory_space<vmem>>, vector<16x128xf32>
    %c0_1 = arith.constant 0 : index
    %c0_2 = arith.constant 0 : index
    %1 = vector.load %arg2[%c0_1, %c0_2] : memref<1x128xf32, #tpu.memory_space<vmem>>, vector<1x128xf32>
    %c0_3 = arith.constant 0 : index
    %c0_4 = arith.constant 0 : index
    %2 = vector.load %arg3[%c0_3, %c0_4] : memref<1x128xf32, #tpu.memory_space<vmem>>, vector<1x128xf32>
    %cst = arith.constant dense<0.000000e+00> : vector<16xf32>
    %3 = vector.multi_reduction <add>, %0, %cst [1] : vector<16x128xf32> to vector<16xf32>
    %4 = vector.shape_cast %3 : vector<16xf32> to vector<16x1xf32>
    %cst_5 = arith.constant 1.280000e+02 : f32
    %5 = vector.broadcast %cst_5 : f32 to vector<16x1xf32>
    %6 = arith.divf %4, %5 : vector<16x1xf32>
    %7 = vector.broadcast %6 : vector<16x1xf32> to vector<16x128xf32>
    %8 = arith.subf %0, %7 : vector<16x128xf32>
    %9 = arith.mulf %8, %8 : vector<16x128xf32>
    %cst_6 = arith.constant dense<0.000000e+00> : vector<16xf32>
    %10 = vector.multi_reduction <add>, %9, %cst_6 [1] : vector<16x128xf32> to vector<16xf32>
    %11 = vector.shape_cast %10 : vector<16xf32> to vector<16x1xf32>
    %cst_7 = arith.constant 1.280000e+02 : f32
    %12 = vector.broadcast %cst_7 : f32 to vector<16x1xf32>
    %13 = arith.divf %11, %12 : vector<16x1xf32>
    %cst_8 = arith.constant 9.99999974E-6 : f32
    %14 = vector.broadcast %cst_8 : f32 to vector<16x1xf32>
    %15 = arith.addf %13, %14 : vector<16x1xf32>
    %16 = math.rsqrt %15 : vector<16x1xf32>
    %17 = vector.broadcast %16 : vector<16x1xf32> to vector<16x128xf32>
    %18 = arith.mulf %8, %17 : vector<16x128xf32>
    %19 = vector.broadcast %1 : vector<1x128xf32> to vector<16x128xf32>
    %20 = arith.mulf %18, %19 : vector<16x128xf32>
    %21 = vector.broadcast %2 : vector<1x128xf32> to vector<16x128xf32>
    %22 = arith.addf %20, %21 : vector<16x128xf32>
    %23 = arith.truncf %22 : vector<16x128xf32> to vector<16x128xbf16>
    %c0_9 = arith.constant 0 : index
    %c0_10 = arith.constant 0 : index
    %24 = vector.load %arg4[%c0_9, %c0_10] : memref<128x384xbf16, #tpu.memory_space<vmem>>, vector<128x384xbf16>
    %cst_11 = arith.constant dense<0.000000e+00> : vector<16x384xf32>
    %25 = tpu.matmul %23, %24, %cst_11 {dimension_numbers = #tpu.dot_dimension_numbers<[1], [0], [0], [1], [0, 0, 1, 1], [], []>} : vector<16x128xbf16>, vector<128x384xbf16>, vector<16x384xf32> -> vector<16x384xf32>
    %c0_12 = arith.constant 0 : index
    %c0_13 = arith.constant 0 : index
    %26 = vector.load %arg5[%c0_12, %c0_13] : memref<1x384xf32, #tpu.memory_space<vmem>>, vector<1x384xf32>
    %27 = vector.broadcast %26 : vector<1x384xf32> to vector<16x384xf32>
    %28 = arith.addf %25, %27 : vector<16x384xf32>
    %29 = arith.truncf %28 : vector<16x384xf32> to vector<16x384xbf16>
    %30 = vector.extract_strided_slice %29 {offsets = [0, 0], sizes = [16, 128], strides = [1, 1]} : vector<16x384xbf16> to vector<16x128xbf16>
    %31 = vector.extract_strided_slice %29 {offsets = [0, 128], sizes = [16, 128], strides = [1, 1]} : vector<16x384xbf16> to vector<16x128xbf16>
    %32 = vector.extract_strided_slice %29 {offsets = [0, 256], sizes = [16, 128], strides = [1, 1]} : vector<16x384xbf16> to vector<16x128xbf16>
    %33 = vector.extract_strided_slice %30 {offsets = [0, 0], sizes = [8, 32], strides = [1, 1]} : vector<16x128xbf16> to vector<8x32xbf16>
    %34 = vector.extract_strided_slice %31 {offsets = [0, 0], sizes = [8, 32], strides = [1, 1]} : vector<16x128xbf16> to vector<8x32xbf16>
    %35 = vector.extract_strided_slice %32 {offsets = [0, 0], sizes = [8, 32], strides = [1, 1]} : vector<16x128xbf16> to vector<8x32xbf16>
    %cst_14 = arith.constant dense<0.000000e+00> : vector<8x8xf32>
    %36 = tpu.matmul %33, %34, %cst_14 {dimension_numbers = #tpu.dot_dimension_numbers<[1], [1], [0], [0], [0, 0, 1, 0], [], []>} : vector<8x32xbf16>, vector<8x32xbf16>, vector<8x8xf32> -> vector<8x8xf32>
    %cst_15 = arith.constant 0.176776692 : f32
    %37 = vector.broadcast %cst_15 : f32 to vector<8x8xf32>
    %38 = arith.mulf %36, %37 : vector<8x8xf32>
    %39 = tpu.iota {dimensions = array<i32: 1>} : vector<8x8xi32>
    %c5_i32 = arith.constant 5 : i32
    %40 = vector.broadcast %c5_i32 : i32 to vector<8x8xi32>
    %41 = arith.cmpi slt, %39, %40 : vector<8x8xi32>
    %cst_16 = arith.constant -1.000000e+30 : f32
    %42 = vector.broadcast %cst_16 : f32 to vector<8x8xf32>
    %43 = arith.select %41, %38, %42 : vector<8x8xi1>, vector<8x8xf32>
    %cst_17 = arith.constant dense<0xFF800000> : vector<8xf32>
    %44 = vector.multi_reduction <maximumf>, %43, %cst_17 [1] : vector<8x8xf32> to vector<8xf32>
    %45 = vector.shape_cast %44 : vector<8xf32> to vector<8x1xf32>
    %46 = vector.broadcast %45 : vector<8x1xf32> to vector<8x8xf32>
    %47 = arith.subf %43, %46 : vector<8x8xf32>
    %48 = math.exp %47 : vector<8x8xf32>
    %cst_18 = arith.constant dense<0.000000e+00> : vector<8xf32>
    %49 = vector.multi_reduction <add>, %48, %cst_18 [1] : vector<8x8xf32> to vector<8xf32>
    %50 = vector.shape_cast %49 : vector<8xf32> to vector<8x1xf32>
    %51 = tpu.reciprocal %50 {approx = true} : vector<8x1xf32> -> vector<8x1xf32>
    %52 = vector.broadcast %51 : vector<8x1xf32> to vector<8x8xf32>
    %53 = arith.mulf %48, %52 : vector<8x8xf32>
    %54 = arith.truncf %53 : vector<8x8xf32> to vector<8x8xbf16>
    %cst_19 = arith.constant dense<0.000000e+00> : vector<8x32xf32>
    %55 = tpu.matmul %54, %35, %cst_19 {dimension_numbers = #tpu.dot_dimension_numbers<[1], [0], [0], [1], [0, 0, 1, 1], [], []>} : vector<8x8xbf16>, vector<8x32xbf16>, vector<8x32xf32> -> vector<8x32xf32>
    %56 = vector.extract_strided_slice %30 {offsets = [0, 32], sizes = [8, 32], strides = [1, 1]} : vector<16x128xbf16> to vector<8x32xbf16>
    %57 = vector.extract_strided_slice %31 {offsets = [0, 32], sizes = [8, 32], strides = [1, 1]} : vector<16x128xbf16> to vector<8x32xbf16>
    %58 = vector.extract_strided_slice %32 {offsets = [0, 32], sizes = [8, 32], strides = [1, 1]} : vector<16x128xbf16> to vector<8x32xbf16>
    %cst_20 = arith.constant dense<0.000000e+00> : vector<8x8xf32>
    %59 = tpu.matmul %56, %57, %cst_20 {dimension_numbers = #tpu.dot_dimension_numbers<[1], [1], [0], [0], [0, 0, 1, 0], [], []>} : vector<8x32xbf16>, vector<8x32xbf16>, vector<8x8xf32> -> vector<8x8xf32>
    %cst_21 = arith.constant 0.176776692 : f32
    %60 = vector.broadcast %cst_21 : f32 to vector<8x8xf32>
    %61 = arith.mulf %59, %60 : vector<8x8xf32>
    %62 = tpu.iota {dimensions = array<i32: 1>} : vector<8x8xi32>
    %c5_i32_22 = arith.constant 5 : i32
    %63 = vector.broadcast %c5_i32_22 : i32 to vector<8x8xi32>
    %64 = arith.cmpi slt, %62, %63 : vector<8x8xi32>
    %cst_23 = arith.constant -1.000000e+30 : f32
    %65 = vector.broadcast %cst_23 : f32 to vector<8x8xf32>
    %66 = arith.select %64, %61, %65 : vector<8x8xi1>, vector<8x8xf32>
    %cst_24 = arith.constant dense<0xFF800000> : vector<8xf32>
    %67 = vector.multi_reduction <maximumf>, %66, %cst_24 [1] : vector<8x8xf32> to vector<8xf32>
    %68 = vector.shape_cast %67 : vector<8xf32> to vector<8x1xf32>
    %69 = vector.broadcast %68 : vector<8x1xf32> to vector<8x8xf32>
    %70 = arith.subf %66, %69 : vector<8x8xf32>
    %71 = math.exp %70 : vector<8x8xf32>
    %cst_25 = arith.constant dense<0.000000e+00> : vector<8xf32>
    %72 = vector.multi_reduction <add>, %71, %cst_25 [1] : vector<8x8xf32> to vector<8xf32>
    %73 = vector.shape_cast %72 : vector<8xf32> to vector<8x1xf32>
    %74 = tpu.reciprocal %73 {approx = true} : vector<8x1xf32> -> vector<8x1xf32>
    %75 = vector.broadcast %74 : vector<8x1xf32> to vector<8x8xf32>
    %76 = arith.mulf %71, %75 : vector<8x8xf32>
    %77 = arith.truncf %76 : vector<8x8xf32> to vector<8x8xbf16>
    %cst_26 = arith.constant dense<0.000000e+00> : vector<8x32xf32>
    %78 = tpu.matmul %77, %58, %cst_26 {dimension_numbers = #tpu.dot_dimension_numbers<[1], [0], [0], [1], [0, 0, 1, 1], [], []>} : vector<8x8xbf16>, vector<8x32xbf16>, vector<8x32xf32> -> vector<8x32xf32>
    %79 = vector.extract_strided_slice %30 {offsets = [0, 64], sizes = [8, 32], strides = [1, 1]} : vector<16x128xbf16> to vector<8x32xbf16>
    %80 = vector.extract_strided_slice %31 {offsets = [0, 64], sizes = [8, 32], strides = [1, 1]} : vector<16x128xbf16> to vector<8x32xbf16>
    %81 = vector.extract_strided_slice %32 {offsets = [0, 64], sizes = [8, 32], strides = [1, 1]} : vector<16x128xbf16> to vector<8x32xbf16>
    %cst_27 = arith.constant dense<0.000000e+00> : vector<8x8xf32>
    %82 = tpu.matmul %79, %80, %cst_27 {dimension_numbers = #tpu.dot_dimension_numbers<[1], [1], [0], [0], [0, 0, 1, 0], [], []>} : vector<8x32xbf16>, vector<8x32xbf16>, vector<8x8xf32> -> vector<8x8xf32>
    %cst_28 = arith.constant 0.176776692 : f32
    %83 = vector.broadcast %cst_28 : f32 to vector<8x8xf32>
    %84 = arith.mulf %82, %83 : vector<8x8xf32>
    %85 = tpu.iota {dimensions = array<i32: 1>} : vector<8x8xi32>
    %c5_i32_29 = arith.constant 5 : i32
    %86 = vector.broadcast %c5_i32_29 : i32 to vector<8x8xi32>
    %87 = arith.cmpi slt, %85, %86 : vector<8x8xi32>
    %cst_30 = arith.constant -1.000000e+30 : f32
    %88 = vector.broadcast %cst_30 : f32 to vector<8x8xf32>
    %89 = arith.select %87, %84, %88 : vector<8x8xi1>, vector<8x8xf32>
    %cst_31 = arith.constant dense<0xFF800000> : vector<8xf32>
    %90 = vector.multi_reduction <maximumf>, %89, %cst_31 [1] : vector<8x8xf32> to vector<8xf32>
    %91 = vector.shape_cast %90 : vector<8xf32> to vector<8x1xf32>
    %92 = vector.broadcast %91 : vector<8x1xf32> to vector<8x8xf32>
    %93 = arith.subf %89, %92 : vector<8x8xf32>
    %94 = math.exp %93 : vector<8x8xf32>
    %cst_32 = arith.constant dense<0.000000e+00> : vector<8xf32>
    %95 = vector.multi_reduction <add>, %94, %cst_32 [1] : vector<8x8xf32> to vector<8xf32>
    %96 = vector.shape_cast %95 : vector<8xf32> to vector<8x1xf32>
    %97 = tpu.reciprocal %96 {approx = true} : vector<8x1xf32> -> vector<8x1xf32>
    %98 = vector.broadcast %97 : vector<8x1xf32> to vector<8x8xf32>
    %99 = arith.mulf %94, %98 : vector<8x8xf32>
    %100 = arith.truncf %99 : vector<8x8xf32> to vector<8x8xbf16>
    %cst_33 = arith.constant dense<0.000000e+00> : vector<8x32xf32>
    %101 = tpu.matmul %100, %81, %cst_33 {dimension_numbers = #tpu.dot_dimension_numbers<[1], [0], [0], [1], [0, 0, 1, 1], [], []>} : vector<8x8xbf16>, vector<8x32xbf16>, vector<8x32xf32> -> vector<8x32xf32>
    %102 = vector.extract_strided_slice %30 {offsets = [0, 96], sizes = [8, 32], strides = [1, 1]} : vector<16x128xbf16> to vector<8x32xbf16>
    %103 = vector.extract_strided_slice %31 {offsets = [0, 96], sizes = [8, 32], strides = [1, 1]} : vector<16x128xbf16> to vector<8x32xbf16>
    %104 = vector.extract_strided_slice %32 {offsets = [0, 96], sizes = [8, 32], strides = [1, 1]} : vector<16x128xbf16> to vector<8x32xbf16>
    %cst_34 = arith.constant dense<0.000000e+00> : vector<8x8xf32>
    %105 = tpu.matmul %102, %103, %cst_34 {dimension_numbers = #tpu.dot_dimension_numbers<[1], [1], [0], [0], [0, 0, 1, 0], [], []>} : vector<8x32xbf16>, vector<8x32xbf16>, vector<8x8xf32> -> vector<8x8xf32>
    %cst_35 = arith.constant 0.176776692 : f32
    %106 = vector.broadcast %cst_35 : f32 to vector<8x8xf32>
    %107 = arith.mulf %105, %106 : vector<8x8xf32>
    %108 = tpu.iota {dimensions = array<i32: 1>} : vector<8x8xi32>
    %c5_i32_36 = arith.constant 5 : i32
    %109 = vector.broadcast %c5_i32_36 : i32 to vector<8x8xi32>
    %110 = arith.cmpi slt, %108, %109 : vector<8x8xi32>
    %cst_37 = arith.constant -1.000000e+30 : f32
    %111 = vector.broadcast %cst_37 : f32 to vector<8x8xf32>
    %112 = arith.select %110, %107, %111 : vector<8x8xi1>, vector<8x8xf32>
    %cst_38 = arith.constant dense<0xFF800000> : vector<8xf32>
    %113 = vector.multi_reduction <maximumf>, %112, %cst_38 [1] : vector<8x8xf32> to vector<8xf32>
    %114 = vector.shape_cast %113 : vector<8xf32> to vector<8x1xf32>
    %115 = vector.broadcast %114 : vector<8x1xf32> to vector<8x8xf32>
    %116 = arith.subf %112, %115 : vector<8x8xf32>
    %117 = math.exp %116 : vector<8x8xf32>
    %cst_39 = arith.constant dense<0.000000e+00> : vector<8xf32>
    %118 = vector.multi_reduction <add>, %117, %cst_39 [1] : vector<8x8xf32> to vector<8xf32>
    %119 = vector.shape_cast %118 : vector<8xf32> to vector<8x1xf32>
    %120 = tpu.reciprocal %119 {approx = true} : vector<8x1xf32> -> vector<8x1xf32>
    %121 = vector.broadcast %120 : vector<8x1xf32> to vector<8x8xf32>
    %122 = arith.mulf %117, %121 : vector<8x8xf32>
    %123 = arith.truncf %122 : vector<8x8xf32> to vector<8x8xbf16>
    %cst_40 = arith.constant dense<0.000000e+00> : vector<8x32xf32>
    %124 = tpu.matmul %123, %104, %cst_40 {dimension_numbers = #tpu.dot_dimension_numbers<[1], [0], [0], [1], [0, 0, 1, 1], [], []>} : vector<8x8xbf16>, vector<8x32xbf16>, vector<8x32xf32> -> vector<8x32xf32>
    %125 = tpu.concatenate %55, %78, %101, %124 in 1 : vector<8x32xf32>, vector<8x32xf32>, vector<8x32xf32>, vector<8x32xf32> -> vector<8x128xf32>
    %126 = vector.extract_strided_slice %30 {offsets = [8, 0], sizes = [8, 32], strides = [1, 1]} : vector<16x128xbf16> to vector<8x32xbf16>
    %127 = vector.extract_strided_slice %31 {offsets = [8, 0], sizes = [8, 32], strides = [1, 1]} : vector<16x128xbf16> to vector<8x32xbf16>
    %128 = vector.extract_strided_slice %32 {offsets = [8, 0], sizes = [8, 32], strides = [1, 1]} : vector<16x128xbf16> to vector<8x32xbf16>
    %cst_41 = arith.constant dense<0.000000e+00> : vector<8x8xf32>
    %129 = tpu.matmul %126, %127, %cst_41 {dimension_numbers = #tpu.dot_dimension_numbers<[1], [1], [0], [0], [0, 0, 1, 0], [], []>} : vector<8x32xbf16>, vector<8x32xbf16>, vector<8x8xf32> -> vector<8x8xf32>
    %cst_42 = arith.constant 0.176776692 : f32
    %130 = vector.broadcast %cst_42 : f32 to vector<8x8xf32>
    %131 = arith.mulf %129, %130 : vector<8x8xf32>
    %132 = tpu.iota {dimensions = array<i32: 1>} : vector<8x8xi32>
    %c5_i32_43 = arith.constant 5 : i32
    %133 = vector.broadcast %c5_i32_43 : i32 to vector<8x8xi32>
    %134 = arith.cmpi slt, %132, %133 : vector<8x8xi32>
    %cst_44 = arith.constant -1.000000e+30 : f32
    %135 = vector.broadcast %cst_44 : f32 to vector<8x8xf32>
    %136 = arith.select %134, %131, %135 : vector<8x8xi1>, vector<8x8xf32>
    %cst_45 = arith.constant dense<0xFF800000> : vector<8xf32>
    %137 = vector.multi_reduction <maximumf>, %136, %cst_45 [1] : vector<8x8xf32> to vector<8xf32>
    %138 = vector.shape_cast %137 : vector<8xf32> to vector<8x1xf32>
    %139 = vector.broadcast %138 : vector<8x1xf32> to vector<8x8xf32>
    %140 = arith.subf %136, %139 : vector<8x8xf32>
    %141 = math.exp %140 : vector<8x8xf32>
    %cst_46 = arith.constant dense<0.000000e+00> : vector<8xf32>
    %142 = vector.multi_reduction <add>, %141, %cst_46 [1] : vector<8x8xf32> to vector<8xf32>
    %143 = vector.shape_cast %142 : vector<8xf32> to vector<8x1xf32>
    %144 = tpu.reciprocal %143 {approx = true} : vector<8x1xf32> -> vector<8x1xf32>
    %145 = vector.broadcast %144 : vector<8x1xf32> to vector<8x8xf32>
    %146 = arith.mulf %141, %145 : vector<8x8xf32>
    %147 = arith.truncf %146 : vector<8x8xf32> to vector<8x8xbf16>
    %cst_47 = arith.constant dense<0.000000e+00> : vector<8x32xf32>
    %148 = tpu.matmul %147, %128, %cst_47 {dimension_numbers = #tpu.dot_dimension_numbers<[1], [0], [0], [1], [0, 0, 1, 1], [], []>} : vector<8x8xbf16>, vector<8x32xbf16>, vector<8x32xf32> -> vector<8x32xf32>
    %149 = vector.extract_strided_slice %30 {offsets = [8, 32], sizes = [8, 32], strides = [1, 1]} : vector<16x128xbf16> to vector<8x32xbf16>
    %150 = vector.extract_strided_slice %31 {offsets = [8, 32], sizes = [8, 32], strides = [1, 1]} : vector<16x128xbf16> to vector<8x32xbf16>
    %151 = vector.extract_strided_slice %32 {offsets = [8, 32], sizes = [8, 32], strides = [1, 1]} : vector<16x128xbf16> to vector<8x32xbf16>
    %cst_48 = arith.constant dense<0.000000e+00> : vector<8x8xf32>
    %152 = tpu.matmul %149, %150, %cst_48 {dimension_numbers = #tpu.dot_dimension_numbers<[1], [1], [0], [0], [0, 0, 1, 0], [], []>} : vector<8x32xbf16>, vector<8x32xbf16>, vector<8x8xf32> -> vector<8x8xf32>
    %cst_49 = arith.constant 0.176776692 : f32
    %153 = vector.broadcast %cst_49 : f32 to vector<8x8xf32>
    %154 = arith.mulf %152, %153 : vector<8x8xf32>
    %155 = tpu.iota {dimensions = array<i32: 1>} : vector<8x8xi32>
    %c5_i32_50 = arith.constant 5 : i32
    %156 = vector.broadcast %c5_i32_50 : i32 to vector<8x8xi32>
    %157 = arith.cmpi slt, %155, %156 : vector<8x8xi32>
    %cst_51 = arith.constant -1.000000e+30 : f32
    %158 = vector.broadcast %cst_51 : f32 to vector<8x8xf32>
    %159 = arith.select %157, %154, %158 : vector<8x8xi1>, vector<8x8xf32>
    %cst_52 = arith.constant dense<0xFF800000> : vector<8xf32>
    %160 = vector.multi_reduction <maximumf>, %159, %cst_52 [1] : vector<8x8xf32> to vector<8xf32>
    %161 = vector.shape_cast %160 : vector<8xf32> to vector<8x1xf32>
    %162 = vector.broadcast %161 : vector<8x1xf32> to vector<8x8xf32>
    %163 = arith.subf %159, %162 : vector<8x8xf32>
    %164 = math.exp %163 : vector<8x8xf32>
    %cst_53 = arith.constant dense<0.000000e+00> : vector<8xf32>
    %165 = vector.multi_reduction <add>, %164, %cst_53 [1] : vector<8x8xf32> to vector<8xf32>
    %166 = vector.shape_cast %165 : vector<8xf32> to vector<8x1xf32>
    %167 = tpu.reciprocal %166 {approx = true} : vector<8x1xf32> -> vector<8x1xf32>
    %168 = vector.broadcast %167 : vector<8x1xf32> to vector<8x8xf32>
    %169 = arith.mulf %164, %168 : vector<8x8xf32>
    %170 = arith.truncf %169 : vector<8x8xf32> to vector<8x8xbf16>
    %cst_54 = arith.constant dense<0.000000e+00> : vector<8x32xf32>
    %171 = tpu.matmul %170, %151, %cst_54 {dimension_numbers = #tpu.dot_dimension_numbers<[1], [0], [0], [1], [0, 0, 1, 1], [], []>} : vector<8x8xbf16>, vector<8x32xbf16>, vector<8x32xf32> -> vector<8x32xf32>
    %172 = vector.extract_strided_slice %30 {offsets = [8, 64], sizes = [8, 32], strides = [1, 1]} : vector<16x128xbf16> to vector<8x32xbf16>
    %173 = vector.extract_strided_slice %31 {offsets = [8, 64], sizes = [8, 32], strides = [1, 1]} : vector<16x128xbf16> to vector<8x32xbf16>
    %174 = vector.extract_strided_slice %32 {offsets = [8, 64], sizes = [8, 32], strides = [1, 1]} : vector<16x128xbf16> to vector<8x32xbf16>
    %cst_55 = arith.constant dense<0.000000e+00> : vector<8x8xf32>
    %175 = tpu.matmul %172, %173, %cst_55 {dimension_numbers = #tpu.dot_dimension_numbers<[1], [1], [0], [0], [0, 0, 1, 0], [], []>} : vector<8x32xbf16>, vector<8x32xbf16>, vector<8x8xf32> -> vector<8x8xf32>
    %cst_56 = arith.constant 0.176776692 : f32
    %176 = vector.broadcast %cst_56 : f32 to vector<8x8xf32>
    %177 = arith.mulf %175, %176 : vector<8x8xf32>
    %178 = tpu.iota {dimensions = array<i32: 1>} : vector<8x8xi32>
    %c5_i32_57 = arith.constant 5 : i32
    %179 = vector.broadcast %c5_i32_57 : i32 to vector<8x8xi32>
    %180 = arith.cmpi slt, %178, %179 : vector<8x8xi32>
    %cst_58 = arith.constant -1.000000e+30 : f32
    %181 = vector.broadcast %cst_58 : f32 to vector<8x8xf32>
    %182 = arith.select %180, %177, %181 : vector<8x8xi1>, vector<8x8xf32>
    %cst_59 = arith.constant dense<0xFF800000> : vector<8xf32>
    %183 = vector.multi_reduction <maximumf>, %182, %cst_59 [1] : vector<8x8xf32> to vector<8xf32>
    %184 = vector.shape_cast %183 : vector<8xf32> to vector<8x1xf32>
    %185 = vector.broadcast %184 : vector<8x1xf32> to vector<8x8xf32>
    %186 = arith.subf %182, %185 : vector<8x8xf32>
    %187 = math.exp %186 : vector<8x8xf32>
    %cst_60 = arith.constant dense<0.000000e+00> : vector<8xf32>
    %188 = vector.multi_reduction <add>, %187, %cst_60 [1] : vector<8x8xf32> to vector<8xf32>
    %189 = vector.shape_cast %188 : vector<8xf32> to vector<8x1xf32>
    %190 = tpu.reciprocal %189 {approx = true} : vector<8x1xf32> -> vector<8x1xf32>
    %191 = vector.broadcast %190 : vector<8x1xf32> to vector<8x8xf32>
    %192 = arith.mulf %187, %191 : vector<8x8xf32>
    %193 = arith.truncf %192 : vector<8x8xf32> to vector<8x8xbf16>
    %cst_61 = arith.constant dense<0.000000e+00> : vector<8x32xf32>
    %194 = tpu.matmul %193, %174, %cst_61 {dimension_numbers = #tpu.dot_dimension_numbers<[1], [0], [0], [1], [0, 0, 1, 1], [], []>} : vector<8x8xbf16>, vector<8x32xbf16>, vector<8x32xf32> -> vector<8x32xf32>
    %195 = vector.extract_strided_slice %30 {offsets = [8, 96], sizes = [8, 32], strides = [1, 1]} : vector<16x128xbf16> to vector<8x32xbf16>
    %196 = vector.extract_strided_slice %31 {offsets = [8, 96], sizes = [8, 32], strides = [1, 1]} : vector<16x128xbf16> to vector<8x32xbf16>
    %197 = vector.extract_strided_slice %32 {offsets = [8, 96], sizes = [8, 32], strides = [1, 1]} : vector<16x128xbf16> to vector<8x32xbf16>
    %cst_62 = arith.constant dense<0.000000e+00> : vector<8x8xf32>
    %198 = tpu.matmul %195, %196, %cst_62 {dimension_numbers = #tpu.dot_dimension_numbers<[1], [1], [0], [0], [0, 0, 1, 0], [], []>} : vector<8x32xbf16>, vector<8x32xbf16>, vector<8x8xf32> -> vector<8x8xf32>
    %cst_63 = arith.constant 0.176776692 : f32
    %199 = vector.broadcast %cst_63 : f32 to vector<8x8xf32>
    %200 = arith.mulf %198, %199 : vector<8x8xf32>
    %201 = tpu.iota {dimensions = array<i32: 1>} : vector<8x8xi32>
    %c5_i32_64 = arith.constant 5 : i32
    %202 = vector.broadcast %c5_i32_64 : i32 to vector<8x8xi32>
    %203 = arith.cmpi slt, %201, %202 : vector<8x8xi32>
    %cst_65 = arith.constant -1.000000e+30 : f32
    %204 = vector.broadcast %cst_65 : f32 to vector<8x8xf32>
    %205 = arith.select %203, %200, %204 : vector<8x8xi1>, vector<8x8xf32>
    %cst_66 = arith.constant dense<0xFF800000> : vector<8xf32>
    %206 = vector.multi_reduction <maximumf>, %205, %cst_66 [1] : vector<8x8xf32> to vector<8xf32>
    %207 = vector.shape_cast %206 : vector<8xf32> to vector<8x1xf32>
    %208 = vector.broadcast %207 : vector<8x1xf32> to vector<8x8xf32>
    %209 = arith.subf %205, %208 : vector<8x8xf32>
    %210 = math.exp %209 : vector<8x8xf32>
    %cst_67 = arith.constant dense<0.000000e+00> : vector<8xf32>
    %211 = vector.multi_reduction <add>, %210, %cst_67 [1] : vector<8x8xf32> to vector<8xf32>
    %212 = vector.shape_cast %211 : vector<8xf32> to vector<8x1xf32>
    %213 = tpu.reciprocal %212 {approx = true} : vector<8x1xf32> -> vector<8x1xf32>
    %214 = vector.broadcast %213 : vector<8x1xf32> to vector<8x8xf32>
    %215 = arith.mulf %210, %214 : vector<8x8xf32>
    %216 = arith.truncf %215 : vector<8x8xf32> to vector<8x8xbf16>
    %cst_68 = arith.constant dense<0.000000e+00> : vector<8x32xf32>
    %217 = tpu.matmul %216, %197, %cst_68 {dimension_numbers = #tpu.dot_dimension_numbers<[1], [0], [0], [1], [0, 0, 1, 1], [], []>} : vector<8x8xbf16>, vector<8x32xbf16>, vector<8x32xf32> -> vector<8x32xf32>
    %218 = tpu.concatenate %148, %171, %194, %217 in 1 : vector<8x32xf32>, vector<8x32xf32>, vector<8x32xf32>, vector<8x32xf32> -> vector<8x128xf32>
    %219 = tpu.concatenate %125, %218 in 0 : vector<8x128xf32>, vector<8x128xf32> -> vector<16x128xf32>
    %220 = arith.truncf %219 : vector<16x128xf32> to vector<16x128xbf16>
    %c0_69 = arith.constant 0 : index
    %c0_70 = arith.constant 0 : index
    %221 = vector.load %arg6[%c0_69, %c0_70] : memref<128x128xbf16, #tpu.memory_space<vmem>>, vector<128x128xbf16>
    %cst_71 = arith.constant dense<0.000000e+00> : vector<16x128xf32>
    %222 = tpu.matmul %220, %221, %cst_71 {dimension_numbers = #tpu.dot_dimension_numbers<[1], [0], [0], [1], [0, 0, 1, 1], [], []>} : vector<16x128xbf16>, vector<128x128xbf16>, vector<16x128xf32> -> vector<16x128xf32>
    %c0_72 = arith.constant 0 : index
    %c0_73 = arith.constant 0 : index
    %223 = vector.load %arg7[%c0_72, %c0_73] : memref<1x128xf32, #tpu.memory_space<vmem>>, vector<1x128xf32>
    %224 = vector.broadcast %223 : vector<1x128xf32> to vector<16x128xf32>
    %225 = arith.addf %222, %224 : vector<16x128xf32>
    %226 = arith.addf %0, %225 : vector<16x128xf32>
    %c0_74 = arith.constant 0 : index
    %c0_75 = arith.constant 0 : index
    %227 = vector.load %arg8[%c0_74, %c0_75] : memref<1x128xf32, #tpu.memory_space<vmem>>, vector<1x128xf32>
    %c0_76 = arith.constant 0 : index
    %c0_77 = arith.constant 0 : index
    %228 = vector.load %arg9[%c0_76, %c0_77] : memref<1x128xf32, #tpu.memory_space<vmem>>, vector<1x128xf32>
    %cst_78 = arith.constant dense<0.000000e+00> : vector<16xf32>
    %229 = vector.multi_reduction <add>, %226, %cst_78 [1] : vector<16x128xf32> to vector<16xf32>
    %230 = vector.shape_cast %229 : vector<16xf32> to vector<16x1xf32>
    %cst_79 = arith.constant 1.280000e+02 : f32
    %231 = vector.broadcast %cst_79 : f32 to vector<16x1xf32>
    %232 = arith.divf %230, %231 : vector<16x1xf32>
    %233 = vector.broadcast %232 : vector<16x1xf32> to vector<16x128xf32>
    %234 = arith.subf %226, %233 : vector<16x128xf32>
    %235 = arith.mulf %234, %234 : vector<16x128xf32>
    %cst_80 = arith.constant dense<0.000000e+00> : vector<16xf32>
    %236 = vector.multi_reduction <add>, %235, %cst_80 [1] : vector<16x128xf32> to vector<16xf32>
    %237 = vector.shape_cast %236 : vector<16xf32> to vector<16x1xf32>
    %cst_81 = arith.constant 1.280000e+02 : f32
    %238 = vector.broadcast %cst_81 : f32 to vector<16x1xf32>
    %239 = arith.divf %237, %238 : vector<16x1xf32>
    %cst_82 = arith.constant 9.99999974E-6 : f32
    %240 = vector.broadcast %cst_82 : f32 to vector<16x1xf32>
    %241 = arith.addf %239, %240 : vector<16x1xf32>
    %242 = math.rsqrt %241 : vector<16x1xf32>
    %243 = vector.broadcast %242 : vector<16x1xf32> to vector<16x128xf32>
    %244 = arith.mulf %234, %243 : vector<16x128xf32>
    %245 = vector.broadcast %227 : vector<1x128xf32> to vector<16x128xf32>
    %246 = arith.mulf %244, %245 : vector<16x128xf32>
    %247 = vector.broadcast %228 : vector<1x128xf32> to vector<16x128xf32>
    %248 = arith.addf %246, %247 : vector<16x128xf32>
    %249 = arith.truncf %248 : vector<16x128xf32> to vector<16x128xbf16>
    %c0_83 = arith.constant 0 : index
    %c0_84 = arith.constant 0 : index
    %250 = vector.load %arg10[%c0_83, %c0_84] : memref<128x256xbf16, #tpu.memory_space<vmem>>, vector<128x256xbf16>
    %cst_85 = arith.constant dense<0.000000e+00> : vector<16x256xf32>
    %251 = tpu.matmul %249, %250, %cst_85 {dimension_numbers = #tpu.dot_dimension_numbers<[1], [0], [0], [1], [0, 0, 1, 1], [], []>} : vector<16x128xbf16>, vector<128x256xbf16>, vector<16x256xf32> -> vector<16x256xf32>
    %c0_86 = arith.constant 0 : index
    %c0_87 = arith.constant 0 : index
    %252 = vector.load %arg11[%c0_86, %c0_87] : memref<1x256xf32, #tpu.memory_space<vmem>>, vector<1x256xf32>
    %253 = vector.broadcast %252 : vector<1x256xf32> to vector<16x256xf32>
    %254 = arith.addf %251, %253 : vector<16x256xf32>
    %cst_88 = arith.constant 5.000000e-01 : f32
    %255 = vector.broadcast %cst_88 : f32 to vector<16x256xf32>
    %256 = arith.mulf %255, %254 : vector<16x256xf32>
    %cst_89 = arith.constant 4.471500e-02 : f32
    %257 = vector.broadcast %cst_89 : f32 to vector<16x256xf32>
    %258 = arith.mulf %257, %254 : vector<16x256xf32>
    %259 = arith.mulf %258, %254 : vector<16x256xf32>
    %260 = arith.mulf %259, %254 : vector<16x256xf32>
    %261 = arith.addf %254, %260 : vector<16x256xf32>
    %cst_90 = arith.constant 0.797884583 : f32
    %262 = vector.broadcast %cst_90 : f32 to vector<16x256xf32>
    %263 = arith.mulf %262, %261 : vector<16x256xf32>
    %264 = math.tanh %263 : vector<16x256xf32>
    %cst_91 = arith.constant 1.000000e+00 : f32
    %265 = vector.broadcast %cst_91 : f32 to vector<16x256xf32>
    %266 = arith.addf %265, %264 : vector<16x256xf32>
    %267 = arith.mulf %256, %266 : vector<16x256xf32>
    %268 = arith.truncf %267 : vector<16x256xf32> to vector<16x256xbf16>
    %c0_92 = arith.constant 0 : index
    %c0_93 = arith.constant 0 : index
    %269 = vector.load %arg12[%c0_92, %c0_93] : memref<256x128xbf16, #tpu.memory_space<vmem>>, vector<256x128xbf16>
    %cst_94 = arith.constant dense<0.000000e+00> : vector<16x128xf32>
    %270 = tpu.matmul %268, %269, %cst_94 {dimension_numbers = #tpu.dot_dimension_numbers<[1], [0], [0], [1], [0, 0, 1, 1], [], []>} : vector<16x256xbf16>, vector<256x128xbf16>, vector<16x128xf32> -> vector<16x128xf32>
    %c0_95 = arith.constant 0 : index
    %c0_96 = arith.constant 0 : index
    %271 = vector.load %arg13[%c0_95, %c0_96] : memref<1x128xf32, #tpu.memory_space<vmem>>, vector<1x128xf32>
    %272 = vector.broadcast %271 : vector<1x128xf32> to vector<16x128xf32>
    %273 = arith.addf %270, %272 : vector<16x128xf32>
    %274 = arith.addf %226, %273 : vector<16x128xf32>
    %c0_97 = arith.constant 0 : index
    %c0_98 = arith.constant 0 : index
    %275 = vector.load %arg14[%c0_97, %c0_98] : memref<16x128xf32, #tpu.memory_space<vmem>>, vector<16x128xf32>
    tpu.vector_store %arg14[%c0_97, %c0_98], %274 {strides = array<i32>} : memref<16x128xf32, #tpu.memory_space<vmem>>, vector<16x128xf32>,
    return
  }
  func.func @transform_0(%arg0: i32) -> (i32, i32) {
    %c0_i32 = arith.constant 0 : i32
    %c0_i32_0 = arith.constant 0 : i32
    %c0_i32_1 = arith.constant 0 : i32
    return %c0_i32, %c0_i32_0 : i32, i32
  }
  func.func @transform_1(%arg0: i32) -> (i32, i32) {
    %c0_i32 = arith.constant 0 : i32
    %c0_i32_0 = arith.constant 0 : i32
    %c0_i32_1 = arith.constant 0 : i32
    return %c0_i32, %c0_i32_0 : i32, i32
  }
  func.func @transform_2(%arg0: i32) -> (i32, i32) {
    %c0_i32 = arith.constant 0 : i32
    %c0_i32_0 = arith.constant 0 : i32
    %c0_i32_1 = arith.constant 0 : i32
    return %c0_i32, %c0_i32_0 : i32, i32
  }
  func.func @transform_3(%arg0: i32) -> (i32, i32) {
    %c0_i32 = arith.constant 0 : i32
    %c0_i32_0 = arith.constant 0 : i32
    %c0_i32_1 = arith.constant 0 : i32
    return %c0_i32, %c0_i32_0 : i32, i32
  }
  func.func @transform_4(%arg0: i32) -> (i32, i32) {
    %c0_i32 = arith.constant 0 : i32
    %c0_i32_0 = arith.constant 0 : i32
    %c0_i32_1 = arith.constant 0 : i32
    return %c0_i32, %c0_i32_0 : i32, i32
  }
  func.func @transform_5(%arg0: i32) -> (i32, i32) {
    %c0_i32 = arith.constant 0 : i32
    %c0_i32_0 = arith.constant 0 : i32
    %c0_i32_1 = arith.constant 0 : i32
    return %c0_i32, %c0_i32_0 : i32, i32
  }
  func.func @transform_6(%arg0: i32) -> (i32, i32) {
    %c0_i32 = arith.constant 0 : i32
    %c0_i32_0 = arith.constant 0 : i32
    %c0_i32_1 = arith.constant 0 : i32
    return %c0_i32, %c0_i32_0 : i32, i32
  }
  func.func @transform_7(%arg0: i32) -> (i32, i32) {
    %c0_i32 = arith.constant 0 : i32
    %c0_i32_0 = arith.constant 0 : i32
    %c0_i32_1 = arith.constant 0 : i32
    return %c0_i32, %c0_i32_0 : i32, i32
  }
  func.func @transform_8(%arg0: i32) -> (i32, i32) {
    %c0_i32 = arith.constant 0 : i32
    %c0_i32_0 = arith.constant 0 : i32
    %c0_i32_1 = arith.constant 0 : i32
    return %c0_i32, %c0_i32_0 : i32, i32
  }
  func.func @transform_9(%arg0: i32) -> (i32, i32) {
    %c0_i32 = arith.constant 0 : i32
    %c0_i32_0 = arith.constant 0 : i32
    %c0_i32_1 = arith.constant 0 : i32
    return %c0_i32, %c0_i32_0 : i32, i32
  }
  func.func @transform_10(%arg0: i32) -> (i32, i32) {
    %c0_i32 = arith.constant 0 : i32
    %c0_i32_0 = arith.constant 0 : i32
    %c0_i32_1 = arith.constant 0 : i32
    return %c0_i32, %c0_i32_0 : i32, i32
  }
  func.func @transform_11(%arg0: i32) -> (i32, i32) {
    %c0_i32 = arith.constant 0 : i32
    %c0_i32_0 = arith.constant 0 : i32
    %c0_i32_1 = arith.constant 0 : i32
    return %c0_i32, %c0_i32_0 : i32, i32
  }
  func.func @transform_12(%arg0: i32) -> (i32, i32) {
    %c0_i32 = arith.constant 0 : i32
    %c0_i32_0 = arith.constant 0 : i32
    %c0_i32_1 = arith.constant 0 : i32
    return %c0_i32, %c0_i32_0 : i32, i32
  }
  func.func @transform_13(%arg0: i32) -> (i32, i32) {
    %c0_i32 = arith.constant 0 : i32
    %c0_i32_0 = arith.constant 0 : i32
    %c0_i32_1 = arith.constant 0 : i32
    return %c0_i32, %c0_i32_0 : i32, i32
  }
}

</mosaic_0001>

<bundles_post_ra>
// kernel: _lambda_.3
= control target key start
LH: loop header
LB: loop body
LE: loop exit
PB: predicated region body
PF: predicated region fallthrough
CT: control target
= control target key end

     0   :  { %s940_s12 = smov 0   ;;  %s942_s13 = smov 0   ;;  %s1035_s0 = inlined_call_operand.vmem [shape: bf16[8,1536], index: 0, kind: input, shape index: {}]   ;;  %s1036_s1 = inlined_call_operand.vmem [shape: bf16[1536,128], index: 1, kind: input, shape index: {}]   ;;  %s1037_s2 = inlined_call_operand.vmem [shape: f32[1,128], index: 2, kind: input, shape index: {}]   ;;  %s1038_s3 = inlined_call_operand.vmem [shape: f32[8,128], index: 3, kind: output, shape index: {}]  }
   0x1   :  { %s944_s14 = smov 0  }
   0x2 LB: > { %s25_s15 = sadd.s32 1, %s913_s13  ;;  %p743_p0 = scmp.ge.s32.totalorder %s917_s14, 1  ;;  %s917_s14 = sphi %s944_s14, %s13_s14   ;;  %s913_s13 = sphi %s942_s13, %s1040_s13   ;;  %s909_s12 = sphi %s940_s12, %s1039_s12  }
   0x3   : > { %p26_p1 = scmp.ge.s32.totalorder %s25_s15, 3  ;;  %p189_p2 = scmp.lt.s32.totalorder %s917_s14, 4 }
   0x5   : > { %s1042_s15 = smov (%p26_p1, %s25_s15), 0  ;;  %p190_p3 = pnand %p743_p0, %p189_p2 }
   0x6   : > { %s744_s16 = sshll.u32 (!%p190_p3), %s909_s12, 2  ;;  %s746_s17 = sshll.u32 (!%p190_p3), %s909_s12, 6 }
   0x7   : > { %193 = sbr.rel (%p190_p3) target bundleno = 269 (0x10d), region = 32  ;;  %p233_p4 = scmp.lt.s32.totalorder (!%p190_p3), %s744_s16, 11 }
   0x8   : > { %p241_p5 = scmp.lt.s32.totalorder (!%p190_p3), %s746_s17, 191  ;;  %p748_p6 = scmp.ne.s32.totalorder (!%p190_p3), %s909_s12, 0 }
   0xc   : > { %s1044_s16 = smov (!%p233_p4, %s744_s16), 11  ;;  %s1046_s17 = smov (!%p241_p5, %s746_s17), 191 }
   0xd   : > { %s745_s18 = sshll.u32 %s1044_s16, 2  ;;  %s747_s22 = sshll.u32 %s1046_s17, 2 }
   0xe   : > { %s965_s21 = scalar_lea.vmem %s1035_s0, %s745_s18  ;;  %s970_s25 = scalar_lea.vmem %s1036_s1, %s747_s22 }
   0xf   : > { %263 = sbr.rel (%p748_p6) target bundleno = 22 (0x16), region = 36 }
  0x14   : > { %v919_v0 = vmov 0.0  }
  0x15   : > { %264 = vst [vmem:[%s1038_s3] sm:$0xff] %v919_v0 }
  0x16 PF: > { %v859_v1 = vld [vmem:[%s970_s25 + $0x78] sm:$0xff]   ;;  %v863_v5 = vld [vmem:[%s970_s25 + $0x70] sm:$0xff]   ;;  %v867_v9 = vld [vmem:[%s970_s25 + $0x68] sm:$0xff]   ;;  %p785_p7 = scmp.ne.s32.totalorder %s909_s12, 2 }
  0x17   : > { %v860_v2 = vld [vmem:[%s970_s25 + $0xf8] sm:$0xff]   ;;  %790 = vmatprep.subr.bf16.mxu0 %v859_v1  ;;  %v864_v6 = vld [vmem:[%s970_s25 + $0xf0] sm:$0xff]   ;;  %v868_v10 = vld [vmem:[%s970_s25 + $0xe8] sm:$0xff]  }
  0x18   : > { %v861_v3 = vld [vmem:[%s970_s25 + $0x38] sm:$0xff]   ;;  %812 = vmatprep.subr.bf16.mxu1 %v860_v2  ;;  %v865_v7 = vld [vmem:[%s970_s25 + $0x30] sm:$0xff]   ;;  %v869_v11 = vld [vmem:[%s970_s25 + $0x28] sm:$0xff]  }
  0x19   : > { %v862_v4 = vld [vmem:[%s970_s25 + $0xb8] sm:$0xff]   ;;  %791 = vmatpush3.bf16.msra.mxu0 %v861_v3  ;;  %v866_v8 = vld [vmem:[%s970_s25 + $0xb0] sm:$0xff]   ;;  %v870_v12 = vld [vmem:[%s970_s25 + $0xa8] sm:$0xff]  }
  0x1a   : > { %813 = vmatpush3.bf16.msra.mxu1 %v862_v4  ;;  %792 = vmatprep.subr.bf16.mxu0 %v863_v5  ;;  %v871_v13 = vld [vmem:[%s970_s25 + $0x60] sm:$0xff]   ;;  %v875_v17 = vld [vmem:[%s970_s25 + $0x58] sm:$0xff]   ;;  %v879_v21 = vld [vmem:[%s970_s25 + $0x50] sm:$0xff]  }
  0x1b   : > { %814 = vmatprep.subr.bf16.mxu1 %v864_v6  ;;  %v872_v14 = vld [vmem:[%s970_s25 + $0xe0] sm:$0xff]   ;;  %v876_v18 = vld [vmem:[%s970_s25 + $0xd8] sm:$0xff]   ;;  %v880_v22 = vld [vmem:[%s970_s25 + $0xd0] sm:$0xff]  }
  0x1c   : > { %v873_v15 = vld [vmem:[%s970_s25 + $0x20] sm:$0xff]   ;;  %v877_v19 = vld [vmem:[%s970_s25 + $0x18] sm:$0xff]   ;;  %v881_v23 = vld [vmem:[%s970_s25 + $0x10] sm:$0xff]  }
  0x1d   : > { %793 = vmatpush3.bf16.msra.mxu0 %v865_v7  ;;  %v874_v16 = vld [vmem:[%s970_s25 + $0xa0] sm:$0xff]   ;;  %v878_v20 = vld [vmem:[%s970_s25 + $0x98] sm:$0xff]   ;;  %v882_v24 = vld [vmem:[%s970_s25 + $0x90] sm:$0xff]  }
  0x1e   : > { %815 = vmatpush3.bf16.msra.mxu1 %v866_v8  ;;  %794 = vmatprep.subr.bf16.mxu0 %v867_v9  ;;  %v883_v25 = vld [vmem:[%s970_s25 + $0x48] sm:$0xff]   ;;  %v887_v29 = vld [vmem:[%s970_s25 + $0x40] sm:$0xff]  }
  0x1f   : > { %816 = vmatprep.subr.bf16.mxu1 %v868_v10  ;;  %v884_v26 = vld [vmem:[%s970_s25 + $0xc8] sm:$0xff]   ;;  %v888_v30 = vld [vmem:[%s970_s25 + $0xc0] sm:$0xff]  }
  0x20   : > { %v885_v27 = vld [vmem:[%s970_s25 + $0x8] sm:$0xff]   ;;  %v889_v31 = vld [vmem:[%s970_s25] sm:$0xff]  }
  0x21   : > { %795 = vmatpush3.bf16.msra.mxu0 %v869_v11  ;;  %v886_v28 = vld [vmem:[%s970_s25 + $0x88] sm:$0xff]   ;;  %v890_v32 = vld [vmem:[%s970_s25 + $0x80] sm:$0xff]  }
  0x22   : > { %817 = vmatpush3.bf16.msra.mxu1 %v870_v12  ;;  %796 = vmatprep.subr.bf16.mxu0 %v871_v13  ;;  %v266_v33 = vld [vmem:[%s965_s21] sm:$0xff]  ;;  %v267_v34 = vld [vmem:[%s965_s21 + $0x8] sm:$0xff] }
  0x23   : > { %818 = vmatprep.subr.bf16.mxu1 %v872_v14  ;;  %v749_v35 = vcombine.low %v266_v33, %v266_v33  ;;  %v750_v36 = vcombine.high %v266_v33, %v266_v33  ;;  %v751_v37 = vcombine.low %v267_v34, %v267_v34  ;;  %v752_v38 = vcombine.high %v267_v34, %v267_v34  ;;  %v265_v45 = vld [vmem:[%s1038_s3] sm:$0xff] }
  0x25   : > { %797 = vmatpush3.bf16.msra.mxu0 %v873_v15  ;;  %570 = vmatprep.mubr.bf16.mxu0 %v750_v36 }
  0x26   : > { %819 = vmatpush3.bf16.msra.mxu1 %v874_v16  ;;  %798 = vmatprep.subr.bf16.mxu0 %v875_v17 }
  0x27   : > { %820 = vmatprep.subr.bf16.mxu1 %v876_v18  ;;  %610 = vmatprep.mubr.bf16.mxu1 %v752_v38 }
  0x29   : > { %799 = vmatpush3.bf16.msra.mxu0 %v877_v19 }
  0x2a   : > { %821 = vmatpush3.bf16.msra.mxu1 %v878_v20  ;;  %800 = vmatprep.subr.bf16.mxu0 %v879_v21 }
  0x2b   : > { %822 = vmatprep.subr.bf16.mxu1 %v880_v22 }
  0x2d   : > { %801 = vmatpush3.bf16.msra.mxu0 %v881_v23 }
  0x2e   : > { %823 = vmatpush3.bf16.msra.mxu1 %v882_v24  ;;  %802 = vmatprep.subr.bf16.mxu0 %v883_v25 }
  0x2f   : > { %824 = vmatprep.subr.bf16.mxu1 %v884_v26 }
  0x31   : > { %803 = vmatpush3.bf16.msra.mxu0 %v885_v27 }
  0x32   : > { %825 = vmatpush3.bf16.msra.mxu1 %v886_v28  ;;  %804 = vmatprep.subr.bf16.mxu0 %v887_v29 }
  0x33   : > { %826 = vmatprep.subr.bf16.mxu1 %v888_v30 }
  0x35   : > { %805 = vmatpush3.bf16.msra.mxu0 %v889_v31 }
  0x36   : > { %827 = vmatpush3.bf16.msra.mxu1 %v890_v32 }
  0x38   : > { %571 = vmatmul.mubr.bf16.vlgmr.msra.gmra.mxu0 %v749_v35 }
  0x39   : > { %611 = vmatmul.mubr.bf16.vlgmr.msra.gmra.mxu1 %v751_v37 }
  0xf8   : > { %v806_v39 = vpop.f32.mrf.mxu0 }
  0xf9   : > { %v828_v40 = vpop.f32.mrf.mxu1 }
  0xfa   : > { %v807_v41 = vpop.f32.mrf.mxu0 }
  0xfb   : > { %v829_v42 = vpop.f32.mrf.mxu1  ;;  %v808_v43 = vadd.f32 %v807_v41, %v806_v39 }
  0xfc   : > { %v830_v44 = vadd.f32 %v829_v42, %v828_v40  ;;  %v809_v46 = vpop.f32.mrf.mxu0 }
  0xfd   : > { %v831_v47 = vpop.f32.mrf.mxu1 }
  0xfe   : > { %v613_v48 = vadd.f32 %v830_v44, %v808_v43  ;;  %v810_v49 = vpop.f32.mrf.mxu0  ;;  %623 = sbr.rel (%p785_p7) target bundleno = 269 (0x10d), region = 40 }
  0xff   : > { %v832_v50 = vpop.f32.mrf.mxu1 }
 0x100   : > { %v618_v51 = vadd.f32 %v613_v48, %v265_v45 }
 0x102   : > { %619 = vst [vmem:[%s1038_s3] sm:$0xff] %v618_v51 }
 0x103   : > { %v786_v53 = vld [vmem:[%s1037_s2] ss:$0 sm:$0xff] }
 0x109   : > { %v624_v52 = vld [vmem:[%s1038_s3] sm:$0xff] }
 0x10a   : > { %v632_v54 = vadd.f32 %v786_v53, %v624_v52 }
 0x10c   : > { %633 = vst [vmem:[%s1038_s3] sm:$0xff] %v632_v54 }
 0x10d PF: > { %s13_s14 = sadd.s32 1, %s917_s14   ;;  %s1039_s12 = smov %s913_s13 }
 0x10e   : > { %p10_p8 = scmp.ge.s32.totalorder %s13_s14, 5   ;;  %s1040_s13 = smov %s1042_s15 }
 0x110   :  { %12 = sbr.rel (!%p10_p8) target bundleno = 2 (0x2), region = 76 }

// kernel: _lambda_.4
= control target key start
LH: loop header
LB: loop body
LE: loop exit
PB: predicated region body
PF: predicated region fallthrough
CT: control target
= control target key end

     0   :  { %v2255_v3 = vmov 0.0   ;;  %v2256_v27 = vmov 0   ;;  %vm2257_vm0 = vmmov 0   ;;  %v123_v53 = vlaneseq  ;;  %s2259_s29 = smov 32   ;;  %s2260_s30 = smov 64   ;;  %s2792_s0 = inlined_call_operand.vmem [shape: f32[16,128], index: 0, kind: input, shape index: {}]   ;;  %s2793_s3 = inlined_call_operand.vmem [shape: bf16[128,384], index: 3, kind: input, shape index: {}]   ;;  %s2794_s1 = inlined_call_operand.vmem [shape: f32[1,128], index: 1, kind: input, shape index: {}]   ;;  %s2795_s2 = inlined_call_operand.vmem [shape: f32[1,128], index: 2, kind: input, shape index: {}]   ;;  %s2796_s4 = inlined_call_operand.vmem [shape: f32[1,384], index: 4, kind: input, shape index: {}]   ;;  %s2797_s5 = inlined_call_operand.vmem [shape: bf16[128,128], index: 5, kind: input, shape index: {}]   ;;  %s2798_s6 = inlined_call_operand.vmem [shape: f32[1,128], index: 6, kind: input, shape index: {}]   ;;  %s2799_s9 = inlined_call_operand.vmem [shape: bf16[128,256], index: 9, kind: input, shape index: {}]   ;;  %s2800_s7 = inlined_call_operand.vmem [shape: f32[1,128], index: 7, kind: input, shape index: {}]   ;;  %s2801_s8 = inlined_call_operand.vmem [shape: f32[1,128], index: 8, kind: input, shape index: {}]   ;;  %s2802_s11 = inlined_call_operand.vmem [shape: bf16[256,128], index: 11, kind: input, shape index: {}]   ;;  %s2803_s10 = inlined_call_operand.vmem [shape: f32[1,256], index: 10, kind: input, shape index: {}]   ;;  %s2804_s12 = inlined_call_operand.vmem [shape: f32[1,128], index: 12, kind: input, shape index: {}]   ;;  %s2805_s13 = inlined_call_operand.vmem [shape: f32[16,128], index: 13, kind: output, shape index: {}]  }
   0x1   :  { %v45_v0 = vld [vmem:[%s2792_s0] sm:$0xff]  ;;  %v46_v1 = vld [vmem:[%s2792_s0 + $0x8] sm:$0xff]  ;;  %1968 = vmatprep.subr.bf16.mxu1 %v2255_v3  ;;  %v2128_v5 = vld [vmem:[%s2793_s3 + $0xb0] ss:$12 sps:$4 sm:$0xff]   ;;  %298 = vmatprep.mubr.bf16.mxu0 %v2256_v27  ;;  %vm353_vm1 = vcmask 261120   ;;  %vm421_vm2 = vcmask 1043456  }
   0x2   :  { %49 = vadd.xlane.f32.xlu0 %v45_v0  ;;  %v2125_v2 = vld [vmem:[%s2793_s3 + $0xac] ss:$12 sps:$4 sm:$0xff]   ;;  %v2127_v4 = vld [vmem:[%s2793_s3 + $0xa8] ss:$12 sps:$4 sm:$0xff]   ;;  %1969 = vmatpush3.bf16.msra.mxu1 %v2128_v5  ;;  %v2131_v15 = vld [vmem:[%s2793_s3 + $0x90] ss:$12 sps:$4 sm:$0xff]  }
   0x3   :  { %266 = vmatprep.subr.bf16.mxu0 %v2125_v2  ;;  %1970 = vmatprep.subr.bf16.mxu1 %v2255_v3  ;;  %v2129_v14 = vld [vmem:[%s2793_s3 + $0x94] ss:$12 sps:$4 sm:$0xff]   ;;  %v2132_v16 = vld [vmem:[%s2793_s3 + $0x98] ss:$12 sps:$4 sm:$0xff]   ;;  %v2133_v17 = vld [vmem:[%s2793_s3 + $0x7c] ss:$12 sps:$4 sm:$0xff]  }
   0x4   :  { %267 = vmatpush1.bf16.msra.mxu0 %v2127_v4  ;;  %v2135_v18 = vld [vmem:[%s2793_s3 + $0x78] ss:$12 sps:$4 sm:$0xff]   ;;  %v2136_v19 = vld [vmem:[%s2793_s3 + $0x80] ss:$12 sps:$4 sm:$0xff]   ;;  %v2140_v22 = vld [vmem:[%s2793_s3 + $0x68] ss:$12 sps:$4 sm:$0xff]   ;;  %1984 = vmatprep.mubr.msk.bf16.mxu1 %vm2257_vm0, %v2255_v3 }
   0x5   :  { %268 = vmatprep.subr.bf16.mxu0 %v2129_v14  ;;  %v2137_v20 = vld [vmem:[%s2793_s3 + $0x64] ss:$12 sps:$4 sm:$0xff]   ;;  %v2139_v21 = vld [vmem:[%s2793_s3 + $0x60] ss:$12 sps:$4 sm:$0xff]   ;;  %v2143_v24 = vld [vmem:[%s2793_s3 + $0x48] ss:$12 sps:$4 sm:$0xff]  }
   0x6   :  { %51 = vadd.xlane.f32.xlu0 %v46_v1  ;;  %1971 = vmatpush3.bf16.msra.mxu1 %v2132_v16  ;;  %v2141_v23 = vld [vmem:[%s2793_s3 + $0x4c] ss:$12 sps:$4 sm:$0xff]   ;;  %v2144_v25 = vld [vmem:[%s2793_s3 + $0x50] ss:$12 sps:$4 sm:$0xff]   ;;  %v2145_v26 = vld [vmem:[%s2793_s3 + $0x34] ss:$12 sps:$4 sm:$0xff]  }
   0x7   :  { %1972 = vmatprep.subr.bf16.mxu1 %v2255_v3  ;;  %v2147_v28 = vld [vmem:[%s2793_s3 + $0x30] ss:$12 sps:$4 sm:$0xff]   ;;  %v2148_v29 = vld [vmem:[%s2793_s3 + $0x38] ss:$12 sps:$4 sm:$0xff]   ;;  %v2152_v32 = vld [vmem:[%s2793_s3 + $0x20] ss:$12 sps:$4 sm:$0xff]  }
   0x8   :  { %269 = vmatpush1.bf16.msra.mxu0 %v2131_v15  ;;  %v2149_v30 = vld [vmem:[%s2793_s3 + $0x1c] ss:$12 sps:$4 sm:$0xff]   ;;  %v2151_v31 = vld [vmem:[%s2793_s3 + $0x18] ss:$12 sps:$4 sm:$0xff]   ;;  %v2155_v34 = vld [vmem:[%s2793_s3] ss:$12 sps:$4 sm:$0xff]  }
   0x9   :  { %270 = vmatprep.subr.bf16.mxu0 %v2133_v17  ;;  %v2153_v33 = vld [vmem:[%s2793_s3 + $0x4] ss:$12 sps:$4 sm:$0xff]   ;;  %v2156_v35 = vld [vmem:[%s2793_s3 + $0x8] ss:$12 sps:$4 sm:$0xff]   ;;  %v1810_v44 = vld [vmem:[%s2794_s1] ss:$0 sm:$0xff] }
   0xa   :  { %1973 = vmatpush3.bf16.msra.mxu1 %v2136_v19  ;;  %v1811_v48 = vld [vmem:[%s2795_s2] ss:$0 sm:$0xff]  ;;  %v2442_v54 = vshrl.u32 %v123_v53, 7  ;;  %vm405_vm4 = vcmask 64512   ;;  %vm817_vm5 = vcmask 523264   ;;  %vm819_vm6 = vcmask 785408  }
   0xb   :  { %1974 = vmatprep.subr.bf16.mxu1 %v2255_v3  ;;  %v121_v58 = vld [vmem:[%s2796_s4] sm:$0x7]  ;;  %s2258_s4 = smov 96  }
   0xc   :  { %271 = vmatpush1.bf16.msra.mxu0 %v2135_v18  ;;  %v129_v55 = vsub.s32 1, %v2442_v54  ;;  %v125_v4 = vsub.s32 0, %v2442_v54  ;;  %v2464_v18 = vand.u32 127, %v123_v53 }
   0xd   :  { %272 = vmatprep.subr.bf16.mxu0 %v2137_v20 }
   0xe   :  { %1975 = vmatpush3.bf16.msra.mxu1 %v2140_v22  ;;  %v130_v61 = vrot.slane %v121_v58, %v129_v55  ;;  %vm403_vm3 = vcmp.lt.s32.totalorder %v2464_v18, 5 }
   0xf   :  { %1976 = vmatprep.subr.bf16.mxu1 %v2255_v3 }
  0x10   :  { %273 = vmatpush1.bf16.msra.mxu0 %v2139_v21 }
  0x11   :  { %274 = vmatprep.subr.bf16.mxu0 %v2141_v23 }
  0x12   :  { %1977 = vmatpush3.bf16.msra.mxu1 %v2144_v25 }
  0x13   :  { %1978 = vmatprep.subr.bf16.mxu1 %v2255_v3 }
  0x14   :  { %275 = vmatpush1.bf16.msra.mxu0 %v2143_v24 }
  0x15   :  { %276 = vmatprep.subr.bf16.mxu0 %v2145_v26 }
  0x16   :  { %1979 = vmatpush3.bf16.msra.mxu1 %v2148_v29 }
  0x17   :  { %1980 = vmatprep.subr.bf16.mxu1 %v2255_v3 }
  0x18   :  { %277 = vmatpush1.bf16.msra.mxu0 %v2147_v28 }
  0x19   :  { %278 = vmatprep.subr.bf16.mxu0 %v2149_v30 }
  0x1a   :  { %1981 = vmatpush3.bf16.msra.mxu1 %v2152_v32 }
  0x1b   :  { %1982 = vmatprep.subr.bf16.mxu1 %v2255_v3 }
  0x1c   :  { %279 = vmatpush1.bf16.msra.mxu0 %v2151_v31 }
  0x1d   :  { %280 = vmatprep.subr.bf16.mxu0 %v2153_v33 }
  0x1e   :  { %1983 = vmatpush3.bf16.msra.mxu1 %v2156_v35 }
  0x1f   :  { %1988 = vmatprep.subr.bf16.mxu1 %v2255_v3 }
  0x20   :  { %281 = vmatpush1.bf16.msra.mxu0 %v2155_v34 }
  0x21   :  { %2012 = vmatprep.subr.bf16.mxu0 %v2255_v3 }
  0x8b   :  { %v50_v6 = vpop.xlane.xlu0 %49 }
  0x8c   :  { %v54_v7 = vmul.f32 0.0078125, %v50_v6 }
  0x8e   :  { %v2348_v8 = vsub.f32 %v45_v0, %v54_v7  ;;  %v133_v0 = vsub.s32 2, %v2442_v54 }
  0x8f   :  { %v52_v9 = vpop.xlane.xlu0 %51 }
  0x90   :  { %v55_v10 = vmul.f32 0.0078125, %v52_v9  ;;  %v58_v11 = vmul.f32 %v2348_v8, %v2348_v8  ;;  %v134_v7 = vrot.slane %v121_v58, %v133_v0  ;;  %v126_v9 = vrot.slane %v121_v58, %v125_v4 }
  0x92   :  { %v2352_v12 = vsub.f32 %v46_v1, %v55_v10  ;;  %60 = vadd.xlane.f32.xlu1 %v58_v11 }
  0x94   :  { %v59_v13 = vmul.f32 %v2352_v12, %v2352_v12 }
  0x96   :  { %62 = vadd.xlane.f32.xlu1 %v59_v13 }
 0x11b   :  { %v61_v36 = vpop.xlane.xlu1 %60 }
 0x11c   :  { %v64_v37 = vmul.f32 0.0078125, %v61_v36 }
 0x11e   :  { %v66_v38 = vadd.f32 1e-05, %v64_v37 }
 0x11f   :  { %v63_v39 = vpop.xlane.xlu1 %62 }
 0x120   :  { %2205 = vrsqrt.f32 %v66_v38  ;;  %v65_v40 = vmul.f32 0.0078125, %v63_v39 }
 0x122   :  { %v67_v41 = vadd.f32 1e-05, %v65_v40 }
 0x124   :  { %2207 = vrsqrt.f32 %v67_v41 }
 0x12d   :  { %v2206_v42 = vpop.eup %2205 }
 0x12e   :  { %v70_v43 = vmul.f32 %v2206_v42, %v2348_v8 }
 0x130   :  { %v78_v47 = vmul.f32 %v1810_v44, %v70_v43 }
 0x131   :  { %v2208_v45 = vpop.eup %2207 }
 0x132   :  { %v71_v46 = vmul.f32 %v2208_v45, %v2352_v12  ;;  %v86_v50 = vadd.f32 %v1811_v48, %v78_v47 }
 0x134   :  { %v79_v49 = vmul.f32 %v1810_v44, %v71_v46 }
 0x136   :  { %v87_v51 = vadd.f32 %v1811_v48, %v79_v49 }
 0x138   :  { %v88_v52 = vpack.c.bf16 %v87_v51, %v86_v50 }
 0x13a   :  { %299 = vmatmul.mubr.bf16.vlgmr.msra.gmra.mxu0 %v88_v52  ;;  %1985 = vmatmul.mubr.bf16.vlgmr.msra.gmra.mxu1 %v88_v52 }
 0x13b   :  { %1990 = vmatprep.mubr.msk.bf16.mxu1 %vm2257_vm0, %v2255_v3  ;;  %2014 = vmatprep.mubr.msk.bf16.mxu0 %vm2257_vm0, %v2255_v3 }
 0x1fa   :  { %v300_v56 = vpop.f32.mrf.mxu0  ;;  %v343_v57 = vpop.f32.mrf.mxu1 }
 0x1fb   :  { %v344_v12 = vadd.f32 %v343_v57, %v134_v7  ;;  %v301_v14 = vadd.f32 %v300_v56, %v126_v9 }
 0x1fc   :  { %v302_v59 = vpop.f32.mrf.mxu0  ;;  %v1986_v60 = vpop.f32.mrf.mxu1 }
 0x1fd   :  { %v303_v5 = vadd.f32 %v302_v59, %v130_v61 }
 0x1fe   :  { %v304_v62 = vpop.f32.mrf.mxu0  ;;  %v346_v63 = vpop.f32.mrf.mxu1 }
 0x1ff   :  { %v347_v10 = vadd.f32 %v346_v63, %v134_v7  ;;  %v305_v13 = vadd.f32 %v304_v62, %v126_v9 }
 0x200   :  { %v306_v1 = vpop.f32.mrf.mxu0  ;;  %v1987_v2 = vpop.f32.mrf.mxu1 }
 0x201   :  { %v307_v6 = vadd.f32 %v306_v1, %v130_v61  ;;  %v2456_v15 = vpack.c.bf16 %v347_v10, %v344_v12  ;;  %v350_v16 = vpack.c.bf16 %v305_v13, %v301_v14 }
 0x203   :  { %v351_v8 = vpack.c.bf16 %v307_v6, %v303_v5  ;;  %v423_v17 = vsel %vm421_vm2, %v2456_v15, 0  ;;  %v821_v33 = vrot.slane %v350_v16, 4 }
 0x205   :  { %v358_v11 = vsel %vm353_vm1, %v351_v8, 0  ;;  %v822_v26 = vrot.slane %v351_v8, 4 }
 0x206   :  { %1989 = vmatpush3.bf16.xpose.msra.mxu1 %v358_v11 }
 0x207   :  { %1994 = vmatprep.subr.bf16.mxu1 %v2255_v3  ;;  %v827_v47 = vsel %vm353_vm1, %v822_v26, 0 }
 0x20d   :  { %1991 = vmatmul.mubr.msk.bf16.vlgmr.msra.gmra.mxu1 %vm353_vm1, %v350_v16 }
 0x20e   :  { %1995 = vmatpush3.bf16.msra.mxu1 %v423_v17  ;;  %1996 = vmatprep.mubr.msk.bf16.mxu1 %vm2257_vm0, %v2255_v3 }
 0x20f   :  { %2000 = vmatprep.subr.bf16.mxu1 %v2255_v3 }
 0x2cd   :  { %v394_v19 = vpop.f32.mrf.mxu1 }
 0x2ce   :  { %v400_v20 = vmul.f32 0.17677669, %v394_v19 }
 0x2cf   :  { %v1992_v21 = vpop.f32.mrf.mxu1 }
 0x2d0   :  { %v404_v22 = vsel %vm403_vm3, %v400_v20, -1e+30 }
 0x2d1   :  { %v397_v23 = vpop.f32.mrf.mxu1  ;;  %v406_v24 = vsel %vm405_vm4, %v404_v22, -inf }
 0x2d2   :  { %407 = vmax.xlane.f32.xlu0 %v406_v24 }
 0x2d3   :  { %v1993_v25 = vpop.f32.mrf.mxu1 }
 0x2e8   :  { %469 = vrot.lane.b32.xlu0 %v351_v8, %s2258_s4 }
 0x2ec   :  { %694 = vrot.lane.b32.xlu0 %v351_v8, %s2259_s29 }
 0x2f0   :  { %932 = vrot.lane.b32.xlu0 %v822_v26, %s2258_s4 }
 0x2f4   :  { %1044 = vrot.lane.b32.xlu0 %v822_v26, %s2260_s30 }
 0x2f8   :  { %1156 = vrot.lane.b32.xlu0 %v822_v26, %s2259_s29 }
 0x35b   :  { %v408_v28 = vpop.xlane.xlu0 %407 }
 0x35c   :  { %v409_v29 = vsub.f32 %v404_v22, %v408_v28 }
 0x35e   :  { %v410_v30 = vmul.f32 1.442695, %v409_v29 }
 0x35f   :  { %v470_v36 = vpop.permute.xlu0 %469 }
 0x360   :  { %2209 = vpow2.f32 %v410_v30  ;;  %v475_v45 = vsel %vm353_vm1, %v470_v36, 0 }
 0x363   :  { %v695_v40 = vpop.permute.xlu0 %694 }
 0x364   :  { %v700_v43 = vsel %vm353_vm1, %v695_v40, 0 }
 0x367   :  { %v933_v48 = vpop.permute.xlu0 %932 }
 0x368   :  { %v938_v49 = vsel %vm353_vm1, %v933_v48, 0 }
 0x36b   :  { %v1045_v50 = vpop.permute.xlu0 %1044 }
 0x36c   :  { %v1050_v52 = vsel %vm353_vm1, %v1045_v50, 0 }
 0x36d   :  { %v2210_v31 = vpop.eup %2209 }
 0x36e   :  { %v412_v32 = vsel %vm405_vm4, %v2210_v31, 0.0 }
 0x36f   :  { %413 = vadd.xlane.f32.xlu1 %v412_v32  ;;  %v1157_v53 = vpop.permute.xlu0 %1156 }
 0x370   :  { %v1162_v57 = vsel %vm353_vm1, %v1157_v53, 0 }
 0x380   :  { %466 = vrot.lane.b32.xlu1 %v350_v16, %s2258_s4 }
 0x384   :  { %582 = vrot.lane.b32.xlu1 %v351_v8, %s2260_s30 }
 0x388   :  { %580 = vrot.lane.b32.xlu1 %v350_v16, %s2260_s30 }
 0x38c   :  { %692 = vrot.lane.b32.xlu1 %v350_v16, %s2259_s29 }
 0x390   :  { %930 = vrot.lane.b32.xlu1 %v821_v33, %s2258_s4 }
 0x394   :  { %1042 = vrot.lane.b32.xlu1 %v821_v33, %s2260_s30 }
 0x398   :  { %1154 = vrot.lane.b32.xlu1 %v821_v33, %s2259_s29 }
 0x3f8   :  { %v414_v34 = vpop.xlane.xlu1 %413 }
 0x3f9   :  { %2211 = vrcp.f32 %v414_v34 }
 0x3fc   :  { %v467_v35 = vpop.permute.xlu1 %466 }
 0x400   :  { %v583_v37 = vpop.permute.xlu1 %582 }
 0x401   :  { %v588_v38 = vsel %vm353_vm1, %v583_v37, 0 }
 0x402   :  { %2013 = vmatpush3.bf16.xpose.msra.mxu0 %v588_v38 }
 0x403   :  { %2024 = vmatprep.subr.bf16.mxu0 %v2255_v3 }
 0x404   :  { %v581_v42 = vpop.permute.xlu1 %580 }
 0x406   :  { %v2212_v39 = vpop.eup %2211 }
 0x407   :  { %v416_v41 = vmul.f32 %v2212_v39, %v2210_v31 }
 0x408   :  { %v693_v46 = vpop.permute.xlu1 %692 }
 0x409   :  { %2015 = vmatmul.mubr.msk.bf16.vlgmr.msra.gmra.mxu0 %vm353_vm1, %v581_v42  ;;  %v417_v44 = vpack.c.bf16 %v416_v41, %v416_v41 }
 0x40a   :  { %2025 = vmatpush3.bf16.xpose.msra.mxu0 %v700_v43  ;;  %2026 = vmatprep.mubr.msk.bf16.mxu0 %vm2257_vm0, %v2255_v3 }
 0x40b   :  { %1997 = vmatmul.mubr.msk.bf16.vlgmr.msra.gmra.mxu1 %vm405_vm4, %v417_v44  ;;  %2036 = vmatprep.subr.bf16.mxu0 %v2255_v3 }
 0x40c   :  { %2001 = vmatpush3.bf16.xpose.msra.mxu1 %v475_v45  ;;  %2002 = vmatprep.mubr.msk.bf16.mxu1 %vm2257_vm0, %v2255_v3  ;;  %v931_v51 = vpop.permute.xlu1 %930 }
 0x40d   :  { %2006 = vmatprep.subr.bf16.mxu1 %v2255_v3 }
 0x410   :  { %v1043_v56 = vpop.permute.xlu1 %1042 }
 0x411   :  { %2027 = vmatmul.mubr.msk.bf16.vlgmr.msra.gmra.mxu0 %vm353_vm1, %v693_v46 }
 0x412   :  { %2037 = vmatpush3.bf16.xpose.msra.mxu0 %v827_v47  ;;  %2038 = vmatprep.mubr.msk.bf16.mxu0 %vm2257_vm0, %v2255_v3 }
 0x413   :  { %2003 = vmatmul.mubr.msk.bf16.vlgmr.msra.gmra.mxu1 %vm353_vm1, %v467_v35  ;;  %2048 = vmatprep.subr.bf16.mxu0 %v2255_v3 }
 0x414   :  { %2008 = vmatprep.mubr.msk.bf16.mxu1 %vm2257_vm0, %v2255_v3  ;;  %v1155_v58 = vpop.permute.xlu1 %1154 }
 0x419   :  { %2039 = vmatmul.mubr.msk.bf16.vlgmr.msra.gmra.mxu0 %vm353_vm1, %v821_v33 }
 0x41a   :  { %2049 = vmatpush3.bf16.xpose.msra.mxu0 %v938_v49  ;;  %2050 = vmatprep.mubr.msk.bf16.mxu0 %vm2257_vm0, %v2255_v3 }
 0x41b   :  { %2060 = vmatprep.subr.bf16.mxu0 %v2255_v3 }
 0x421   :  { %2051 = vmatmul.mubr.msk.bf16.vlgmr.msra.gmra.mxu0 %vm353_vm1, %v931_v51 }
 0x422   :  { %2061 = vmatpush3.bf16.xpose.msra.mxu0 %v1050_v52  ;;  %2062 = vmatprep.mubr.msk.bf16.mxu0 %vm2257_vm0, %v2255_v3 }
 0x423   :  { %2072 = vmatprep.subr.bf16.mxu0 %v2255_v3 }
 0x429   :  { %2063 = vmatmul.mubr.msk.bf16.vlgmr.msra.gmra.mxu0 %vm353_vm1, %v1043_v56 }
 0x42a   :  { %2073 = vmatpush3.bf16.xpose.msra.mxu0 %v1162_v57  ;;  %2074 = vmatprep.mubr.msk.bf16.mxu0 %vm2257_vm0, %v2255_v3 }
 0x42b   :  { %2084 = vmatprep.subr.bf16.mxu0 %v2255_v3 }
 0x431   :  { %2075 = vmatmul.mubr.msk.bf16.vlgmr.msra.gmra.mxu0 %vm353_vm1, %v1155_v58 }
 0x432   :  { %2100 = vmatprep.mubr.msk.bf16.mxu0 %vm2257_vm0, %v2255_v3 }
 0x4c9   :  { %v624_v59 = vpop.f32.mrf.mxu0 }
 0x4ca   :  { %v630_v60 = vmul.f32 0.17677669, %v624_v59 }
 0x4cb   :  { %v2521_v61 = vpop.f32.mrf.mxu1  ;;  %v2016_v62 = vpop.f32.mrf.mxu0 }
 0x4cc   :  { %v631_v63 = vsel %vm403_vm3, %v630_v60, -1e+30 }
 0x4cd   :  { %v1998_v0 = vpop.f32.mrf.mxu1  ;;  %v627_v1 = vpop.f32.mrf.mxu0  ;;  %v632_v2 = vsel %vm405_vm4, %v631_v63, -inf }
 0x4ce   :  { %633 = vmax.xlane.f32.xlu1 %v632_v2 }
 0x4cf   :  { %v462_v5 = vpop.f32.mrf.mxu1  ;;  %v2017_v6 = vpop.f32.mrf.mxu0 }
 0x4d1   :  { %v1999_v7 = vpop.f32.mrf.mxu1  ;;  %v736_v8 = vpop.f32.mrf.mxu0 }
 0x4d2   :  { %v742_v11 = vmul.f32 0.17677669, %v736_v8 }
 0x4d3   :  { %v511_v9 = vpop.f32.mrf.mxu1  ;;  %v2028_v10 = vpop.f32.mrf.mxu0 }
 0x4d4   :  { %v517_v12 = vmul.f32 0.17677669, %v511_v9  ;;  %v743_v21 = vsel %vm403_vm3, %v742_v11, -1e+30 }
 0x4d5   :  { %v2004_v13 = vpop.f32.mrf.mxu1  ;;  %v739_v14 = vpop.f32.mrf.mxu0  ;;  %v744_v26 = vsel %vm405_vm4, %v743_v21, -inf }
 0x4d6   :  { %v518_v16 = vsel %vm403_vm3, %v517_v12, -1e+30 }
 0x4d7   :  { %v514_v17 = vpop.f32.mrf.mxu1  ;;  %v2029_v19 = vpop.f32.mrf.mxu0  ;;  %v519_v20 = vsel %vm405_vm4, %v518_v16, -inf }
 0x4d8   :  { %520 = vmax.xlane.f32.xlu0 %v519_v20 }
 0x4d9   :  { %v2005_v22 = vpop.f32.mrf.mxu1  ;;  %v863_v23 = vpop.f32.mrf.mxu0 }
 0x4da   :  { %v869_v24 = vmul.f32 0.17677669, %v863_v23 }
 0x4db   :  { %v2040_v25 = vpop.f32.mrf.mxu0 }
 0x4dc   :  { %745 = vmax.xlane.f32.xlu0 %v744_v26  ;;  %v870_v28 = vsel %vm403_vm3, %v869_v24, -1e+30 }
 0x4dd   :  { %v866_v29 = vpop.f32.mrf.mxu0  ;;  %v871_v31 = vsel %vm405_vm4, %v870_v28, -inf }
 0x4df   :  { %v2041_v30 = vpop.f32.mrf.mxu0 }
 0x4e0   :  { %872 = vmax.xlane.f32.xlu0 %v871_v31  ;;  %v883_v31 = vrot.slane %v2456_v15, 4 }
 0x4e1   :  { %v974_v32 = vpop.f32.mrf.mxu0 }
 0x4e2   :  { %v980_v33 = vmul.f32 0.17677669, %v974_v32 }
 0x4e3   :  { %v2052_v34 = vpop.f32.mrf.mxu0 }
 0x4e4   :  { %v981_v35 = vsel %vm403_vm3, %v980_v33, -1e+30 }
 0x4e5   :  { %v977_v36 = vpop.f32.mrf.mxu0  ;;  %v982_v37 = vsel %vm405_vm4, %v981_v35, -inf }
 0x4e6   :  { %983 = vmax.xlane.f32.xlu0 %v982_v37 }
 0x4e7   :  { %v2053_v38 = vpop.f32.mrf.mxu0 }
 0x4e9   :  { %v1086_v39 = vpop.f32.mrf.mxu0 }
 0x4ea   :  { %v1092_v40 = vmul.f32 0.17677669, %v1086_v39 }
 0x4eb   :  { %v2064_v41 = vpop.f32.mrf.mxu0 }
 0x4ec   :  { %v1093_v42 = vsel %vm403_vm3, %v1092_v40, -1e+30 }
 0x4ed   :  { %v1089_v43 = vpop.f32.mrf.mxu0  ;;  %v1094_v44 = vsel %vm405_vm4, %v1093_v42, -inf }
 0x4ee   :  { %1095 = vmax.xlane.f32.xlu1 %v1094_v44 }
 0x4ef   :  { %v2065_v45 = vpop.f32.mrf.mxu0 }
 0x4f1   :  { %v1198_v46 = vpop.f32.mrf.mxu0 }
 0x4f2   :  { %v1204_v47 = vmul.f32 0.17677669, %v1198_v46 }
 0x4f3   :  { %v2076_v48 = vpop.f32.mrf.mxu0 }
 0x4f4   :  { %v1205_v49 = vsel %vm403_vm3, %v1204_v47, -1e+30 }
 0x4f5   :  { %v1201_v50 = vpop.f32.mrf.mxu0  ;;  %v1206_v51 = vsel %vm405_vm4, %v1205_v49, -inf }
 0x4f6   :  { %1207 = vmax.xlane.f32.xlu0 %v1206_v51 }
 0x4f7   :  { %v2077_v52 = vpop.f32.mrf.mxu0 }
 0x4f8   :  { %v888_v52 = vsel %vm421_vm2, %v883_v31, 0 }
 0x557   :  { %v634_v53 = vpop.xlane.xlu1 %633 }
 0x558   :  { %v635_v56 = vsub.f32 %v631_v63, %v634_v53 }
 0x55a   :  { %v636_v57 = vmul.f32 1.442695, %v635_v56 }
 0x55c   :  { %2213 = vpow2.f32 %v636_v57 }
 0x561   :  { %v521_v58 = vpop.xlane.xlu0 %520 }
 0x562   :  { %v522_v59 = vsub.f32 %v518_v16, %v521_v58 }
 0x564   :  { %v523_v0 = vmul.f32 1.442695, %v522_v59 }
 0x565   :  { %v746_v60 = vpop.xlane.xlu0 %745 }
 0x566   :  { %v747_v62 = vsub.f32 %v743_v21, %v746_v60 }
 0x568   :  { %v748_v1 = vmul.f32 1.442695, %v747_v62 }
 0x569   :  { %v2544_v2 = vpop.eup %2213  ;;  %v873_v5 = vpop.xlane.xlu0 %872 }
 0x56a   :  { %2215 = vpow2.f32 %v748_v1  ;;  %v874_v18 = vsub.f32 %v870_v28, %v873_v5  ;;  %v638_v6 = vsel %vm405_vm4, %v2544_v2, 0.0 }
 0x56b   :  { %639 = vadd.xlane.f32.xlu0 %v638_v6  ;;  %2217 = vpow2.f32 %v523_v0 }
 0x56c   :  { %v875_v7 = vmul.f32 1.442695, %v874_v18 }
 0x56e   :  { %2219 = vpow2.f32 %v875_v7 }
 0x56f   :  { %v984_v63 = vpop.xlane.xlu0 %983 }
 0x570   :  { %v985_v8 = vsub.f32 %v981_v35, %v984_v63 }
 0x572   :  { %v986_v9 = vmul.f32 1.442695, %v985_v8 }
 0x574   :  { %2221 = vpow2.f32 %v986_v9 }
 0x577   :  { %v2548_v10 = vpop.eup %2215  ;;  %v1096_v20 = vpop.xlane.xlu1 %1095 }
 0x578   :  { %v750_v11 = vsel %vm405_vm4, %v2548_v10, 0.0  ;;  %v2218_v12 = vpop.eup %2217  ;;  %v1097_v21 = vsub.f32 %v1093_v42, %v1096_v20 }
 0x579   :  { %751 = vadd.xlane.f32.xlu1 %v750_v11  ;;  %v525_v14 = vsel %vm405_vm4, %v2218_v12, 0.0 }
 0x57a   :  { %v1098_v22 = vmul.f32 1.442695, %v1097_v21 }
 0x57b   :  { %v2552_v13 = vpop.eup %2219 }
 0x57c   :  { %v877_v16 = vsel %vm405_vm4, %v2552_v13, 0.0  ;;  %2223 = vpow2.f32 %v1098_v22 }
 0x57d   :  { %526 = vadd.xlane.f32.xlu1 %v525_v14  ;;  %878 = vadd.xlane.f32.xlu0 %v877_v16 }
 0x57f   :  { %v1208_v23 = vpop.xlane.xlu0 %1207 }
 0x580   :  { %v1209_v24 = vsub.f32 %v1205_v49, %v1208_v23 }
 0x581   :  { %v2557_v17 = vpop.eup %2221 }
 0x582   :  { %v988_v19 = vsel %vm405_vm4, %v2557_v17, 0.0  ;;  %v1210_v25 = vmul.f32 1.442695, %v1209_v24 }
 0x583   :  { %989 = vadd.xlane.f32.xlu0 %v988_v19 }
 0x584   :  { %2225 = vpow2.f32 %v1210_v25 }
 0x589   :  { %v2567_v26 = vpop.eup %2223 }
 0x58a   :  { %v1100_v28 = vsel %vm405_vm4, %v2567_v26, 0.0 }
 0x58e   :  { %532 = vrot.lane.b32.xlu1 %v2456_v15, %s2258_s4 }
 0x591   :  { %v2571_v29 = vpop.eup %2225 }
 0x592   :  { %v1212_v30 = vsel %vm405_vm4, %v2571_v29, 0.0 }
 0x599   :  { %644 = vrot.lane.b32.xlu0 %v2456_v15, %s2260_s30 }
 0x59d   :  { %756 = vrot.lane.b32.xlu0 %v2456_v15, %s2259_s29 }
 0x5b2   :  { %1101 = vadd.xlane.f32.xlu1 %v1100_v28 }
 0x5bc   :  { %1213 = vadd.xlane.f32.xlu0 %v1212_v30 }
 0x5c3   :  { %994 = vrot.lane.b32.xlu1 %v883_v31, %s2258_s4 }
 0x5c7   :  { %1218 = vrot.lane.b32.xlu1 %v883_v31, %s2259_s29 }
 0x5d2   :  { %1106 = vrot.lane.b32.xlu0 %v883_v31, %s2260_s30 }
 0x5f4   :  { %v640_v34 = vpop.xlane.xlu0 %639 }
 0x602   :  { %v752_v32 = vpop.xlane.xlu1 %751 }
 0x606   :  { %v527_v33 = vpop.xlane.xlu1 %526  ;;  %v879_v37 = vpop.xlane.xlu0 %878 }
 0x607   :  { %2227 = vrcp.f32 %v527_v33  ;;  %v2160_v33 = vld [vmem:[%s2797_s5 + $0x20] sm:$0xff]  }
 0x608   :  { %2229 = vrcp.f32 %v640_v34  ;;  %v2161_v34 = vld [vmem:[%s2797_s5 + $0x18] sm:$0xff]  }
 0x609   :  { %2231 = vrcp.f32 %v752_v32  ;;  %v2159_v32 = vld [vmem:[%s2797_s5 + $0x28] sm:$0xff]  }
 0x60a   :  { %v533_v35 = vpop.permute.xlu1 %532  ;;  %2233 = vrcp.f32 %v879_v37 }
 0x60b   :  { %v538_v36 = vsel %vm421_vm2, %v533_v35, 0 }
 0x60c   :  { %2007 = vmatpush3.bf16.msra.mxu1 %v538_v36  ;;  %v990_v38 = vpop.xlane.xlu0 %989 }
 0x60d   :  { %2018 = vmatprep.subr.bf16.mxu1 %v2255_v3  ;;  %2235 = vrcp.f32 %v990_v38  ;;  %v2162_v38 = vld [vmem:[%s2797_s5 + $0x10] sm:$0xff]  }
 0x610   :  { %v645_v40 = vpop.permute.xlu0 %644 }
 0x611   :  { %v650_v43 = vsel %vm421_vm2, %v645_v40, 0 }
 0x614   :  { %v2228_v15 = vpop.eup %2227  ;;  %v757_v45 = vpop.permute.xlu0 %756 }
 0x615   :  { %v529_v39 = vmul.f32 %v2228_v15, %v2218_v12  ;;  %v2230_v42 = vpop.eup %2229  ;;  %v762_v48 = vsel %vm421_vm2, %v757_v45, 0  ;;  %v2157_v12 = vld [vmem:[%s2797_s5 + $0x38] sm:$0xff]  }
 0x616   :  { %v642_v44 = vmul.f32 %v2230_v42, %v2544_v2  ;;  %v2232_v47 = vpop.eup %2231  ;;  %2085 = vmatpush3.bf16.msra.mxu0 %v2157_v12 }
 0x617   :  { %v530_v41 = vpack.c.bf16 %v529_v39, %v529_v39  ;;  %v754_v49 = vmul.f32 %v2232_v47, %v2548_v10  ;;  %v2234_v51 = vpop.eup %2233  ;;  %2086 = vmatprep.subr.bf16.mxu0 %v2255_v3  ;;  %v2163_v39 = vld [vmem:[%s2797_s5 + $0x8] sm:$0xff]  }
 0x618   :  { %v643_v46 = vpack.c.bf16 %v642_v44, %v642_v44  ;;  %v881_v53 = vmul.f32 %v2234_v51, %v2552_v13  ;;  %v2158_v13 = vld [vmem:[%s2797_s5 + $0x30] sm:$0xff]  }
 0x619   :  { %2009 = vmatmul.mubr.msk.bf16.vlgmr.msra.gmra.mxu1 %vm405_vm4, %v530_v41  ;;  %v755_v50 = vpack.c.bf16 %v754_v49, %v754_v49 }
 0x61a   :  { %2019 = vmatpush3.bf16.msra.mxu1 %v650_v43  ;;  %2020 = vmatprep.mubr.msk.bf16.mxu1 %vm2257_vm0, %v2255_v3  ;;  %v882_v56 = vpack.c.bf16 %v881_v53, %v881_v53  ;;  %v2236_v57 = vpop.eup %2235  ;;  %v2164_v43 = vld [vmem:[%s2797_s5] sm:$0xff]  }
 0x61b   :  { %2030 = vmatprep.subr.bf16.mxu1 %v2255_v3  ;;  %v992_v59 = vmul.f32 %v2236_v57, %v2557_v17  ;;  %2087 = vmatpush3.bf16.msra.mxu0 %v2158_v13 }
 0x61c   :  { %2088 = vmatprep.subr.bf16.mxu0 %v2255_v3 }
 0x61d   :  { %v993_v0 = vpack.c.bf16 %v992_v59, %v992_v59 }
 0x61f   :  { %2089 = vmatpush3.bf16.msra.mxu0 %v2159_v32  ;;  %v2171_v32 = vld [vmem:[%s2799_s9 + $0x50] ss:$8 sps:$4 sm:$0xff]  }
 0x620   :  { %2090 = vmatprep.subr.bf16.mxu0 %v2255_v3 }
 0x621   :  { %2021 = vmatmul.mubr.msk.bf16.vlgmr.msra.gmra.mxu1 %vm405_vm4, %v643_v46 }
 0x622   :  { %2031 = vmatpush3.bf16.msra.mxu1 %v762_v48  ;;  %2032 = vmatprep.mubr.msk.bf16.mxu1 %vm2257_vm0, %v2255_v3 }
 0x623   :  { %2042 = vmatprep.subr.bf16.mxu1 %v2255_v3  ;;  %2091 = vmatpush3.bf16.msra.mxu0 %v2160_v33  ;;  %v2174_v33 = vld [vmem:[%s2799_s9 + $0x40] ss:$8 sps:$4 sm:$0xff]  }
 0x624   :  { %2092 = vmatprep.subr.bf16.mxu0 %v2255_v3 }
 0x627   :  { %2093 = vmatpush3.bf16.msra.mxu0 %v2161_v34  ;;  %v2176_v34 = vld [vmem:[%s2799_s9 + $0x44] ss:$8 sps:$4 sm:$0xff]  }
 0x628   :  { %2094 = vmatprep.subr.bf16.mxu0 %v2255_v3 }
 0x629   :  { %2033 = vmatmul.mubr.msk.bf16.vlgmr.msra.gmra.mxu1 %vm405_vm4, %v755_v50 }
 0x62a   :  { %2043 = vmatpush3.bf16.msra.mxu1 %v888_v52  ;;  %2044 = vmatprep.mubr.msk.bf16.mxu1 %vm2257_vm0, %v2255_v3 }
 0x62b   :  { %2054 = vmatprep.subr.bf16.mxu1 %v2255_v3  ;;  %2095 = vmatpush3.bf16.msra.mxu0 %v2162_v38  ;;  %v2180_v38 = vld [vmem:[%s2799_s9 + $0x20] ss:$8 sps:$4 sm:$0xff]  }
 0x62c   :  { %2096 = vmatprep.subr.bf16.mxu0 %v2255_v3 }
 0x62f   :  { %2097 = vmatpush3.bf16.msra.mxu0 %v2163_v39  ;;  %v2183_v39 = vld [vmem:[%s2799_s9 + $0x10] ss:$8 sps:$4 sm:$0xff]  }
 0x630   :  { %2098 = vmatprep.subr.bf16.mxu0 %v2255_v3 }
 0x631   :  { %2045 = vmatmul.mubr.msk.bf16.vlgmr.msra.gmra.mxu1 %vm405_vm4, %v882_v56 }
 0x632   :  { %2056 = vmatprep.mubr.msk.bf16.mxu1 %vm2257_vm0, %v2255_v3 }
 0x633   :  { %2099 = vmatpush3.bf16.msra.mxu0 %v2164_v43 }
 0x63b   :  { %v1102_v58 = vpop.xlane.xlu1 %1101 }
 0x63c   :  { %2237 = vrcp.f32 %v1102_v58 }
 0x63f   :  { %v995_v60 = vpop.permute.xlu1 %994 }
 0x640   :  { %v1000_v62 = vsel %vm421_vm2, %v995_v60, 0 }
 0x641   :  { %2055 = vmatpush3.bf16.msra.mxu1 %v1000_v62 }
 0x642   :  { %2066 = vmatprep.subr.bf16.mxu1 %v2255_v3 }
 0x643   :  { %v1219_v7 = vpop.permute.xlu1 %1218 }
 0x644   :  { %2057 = vmatmul.mubr.msk.bf16.vlgmr.msra.gmra.mxu1 %vm405_vm4, %v993_v0  ;;  %v1224_v8 = vsel %vm421_vm2, %v1219_v7, 0 }
 0x645   :  { %v1214_v1 = vpop.xlane.xlu0 %1213  ;;  %2068 = vmatprep.mubr.msk.bf16.mxu1 %vm2257_vm0, %v2255_v3 }
 0x646   :  { %2239 = vrcp.f32 %v1214_v1 }
 0x649   :  { %v2238_v2 = vpop.eup %2237  ;;  %v1107_v5 = vpop.permute.xlu0 %1106 }
 0x64a   :  { %v1112_v18 = vsel %vm421_vm2, %v1107_v5, 0  ;;  %v1104_v6 = vmul.f32 %v2238_v2, %v2567_v26 }
 0x64b   :  { %2067 = vmatpush3.bf16.msra.mxu1 %v1112_v18 }
 0x64c   :  { %v1105_v63 = vpack.c.bf16 %v1104_v6, %v1104_v6  ;;  %2078 = vmatprep.subr.bf16.mxu1 %v2255_v3 }
 0x64e   :  { %2069 = vmatmul.mubr.msk.bf16.vlgmr.msra.gmra.mxu1 %vm405_vm4, %v1105_v63  ;;  %v1852_v63 = vld [vmem:[%s2798_s6] ss:$0 sm:$0xff] }
 0x64f   :  { %2079 = vmatpush3.bf16.msra.mxu1 %v1224_v8  ;;  %2080 = vmatprep.mubr.msk.bf16.mxu1 %vm2257_vm0, %v2255_v3 }
 0x653   :  { %v2240_v9 = vpop.eup %2239 }
 0x654   :  { %v1216_v10 = vmul.f32 %v2240_v9, %v2571_v29 }
 0x656   :  { %v1217_v11 = vpack.c.bf16 %v1216_v10, %v1216_v10 }
 0x658   :  { %2081 = vmatmul.mubr.msk.bf16.vlgmr.msra.gmra.mxu1 %vm405_vm4, %v1217_v11  ;;  %v2253_v11 = vld [vmem:[%s2792_s0] sm:$0xff] }
 0x659   :  { %1577 = vmatprep.mubr.bf16.mxu1 %v2256_v27 }
 0x6d9   :  { %v574_v14 = vpop.f32.mrf.mxu1 }
 0x6db   :  { %v2010_v16 = vpop.f32.mrf.mxu1 }
 0x6dc   :  { %v2254_v16 = vld [vmem:[%s2792_s0 + $0x8] sm:$0xff] }
 0x6dd   :  { %v577_v17 = vpop.f32.mrf.mxu1 }
 0x6df   :  { %v2011_v19 = vpop.f32.mrf.mxu1 }
 0x6e0   :  { %v2165_v19 = vld [vmem:[%s2799_s9 + $0x70] ss:$8 sps:$4 sm:$0xff]  }
 0x6e1   :  { %v686_v20 = vpop.f32.mrf.mxu1 }
 0x6e3   :  { %v2022_v27 = vpop.f32.mrf.mxu1 }
 0x6e5   :  { %v689_v21 = vpop.f32.mrf.mxu1 }
 0x6e7   :  { %v2023_v22 = vpop.f32.mrf.mxu1 }
 0x6e9   :  { %v798_v23 = vpop.f32.mrf.mxu1 }
 0x6eb   :  { %v2034_v24 = vpop.f32.mrf.mxu1 }
 0x6ed   :  { %v801_v25 = vpop.f32.mrf.mxu1 }
 0x6ef   :  { %v2035_v26 = vpop.f32.mrf.mxu1 }
 0x6f1   :  { %v924_v28 = vpop.f32.mrf.mxu1 }
 0x6f3   :  { %v2046_v29 = vpop.f32.mrf.mxu1 }
 0x6f4   :  { %v2170_v29 = vld [vmem:[%s2799_s9 + $0x64] ss:$8 sps:$4 sm:$0xff]  }
 0x6f5   :  { %v927_v30 = vpop.f32.mrf.mxu1 }
 0x6f6   :  { %v2168_v30 = vld [vmem:[%s2799_s9 + $0x60] ss:$8 sps:$4 sm:$0xff]  }
 0x6f7   :  { %v2047_v31 = vpop.f32.mrf.mxu1 }
 0x6f8   :  { %v2173_v31 = vld [vmem:[%s2799_s9 + $0x54] ss:$8 sps:$4 sm:$0xff]  }
 0x704   :  { %v1036_v35 = vpop.f32.mrf.mxu1 }
 0x705   :  { %v2110_v36 = vpack.i.bf16 %v1036_v35, %v574_v14  ;;  %v2179_v35 = vld [vmem:[%s2799_s9 + $0x34] ss:$8 sps:$4 sm:$0xff]  }
 0x706   :  { %v2058_v37 = vpop.f32.mrf.mxu1 }
 0x707   :  { %2111 = vrot.lane.b32.xlu1 %v2110_v36, %s2259_s29  ;;  %v2177_v36 = vld [vmem:[%s2799_s9 + $0x30] ss:$8 sps:$4 sm:$0xff]   ;;  %v2182_v37 = vld [vmem:[%s2799_s9 + $0x24] ss:$8 sps:$4 sm:$0xff]  }
 0x708   :  { %v1039_v15 = vpop.f32.mrf.mxu1 }
 0x709   :  { %v2185_v15 = vld [vmem:[%s2799_s9 + $0x14] ss:$8 sps:$4 sm:$0xff]  }
 0x70a   :  { %v2059_v40 = vpop.f32.mrf.mxu1 }
 0x70b   :  { %v2188_v40 = vld [vmem:[%s2799_s9 + $0x4] ss:$8 sps:$4 sm:$0xff]  }
 0x70e   :  { %v1148_v41 = vpop.f32.mrf.mxu1 }
 0x70f   :  { %v2115_v42 = vpack.i.bf16 %v1148_v41, %v686_v20  ;;  %v2167_v20 = vld [vmem:[%s2799_s9 + $0x74] ss:$8 sps:$4 sm:$0xff]   ;;  %v2186_v41 = vld [vmem:[%s2799_s9] ss:$8 sps:$4 sm:$0xff]  }
 0x710   :  { %v2070_v44 = vpop.f32.mrf.mxu1  ;;  %1545 = vmatprep.subr.bf16.mxu1 %v2167_v20 }
 0x711   :  { %2116 = vrot.lane.b32.xlu1 %v2115_v42, %s2260_s30  ;;  %1546 = vmatpush1.bf16.msra.mxu1 %v2165_v19 }
 0x712   :  { %v1151_v45 = vpop.f32.mrf.mxu1  ;;  %1547 = vmatprep.subr.bf16.mxu1 %v2170_v29 }
 0x714   :  { %v2071_v46 = vpop.f32.mrf.mxu1 }
 0x715   :  { %1548 = vmatpush1.bf16.msra.mxu1 %v2168_v30 }
 0x716   :  { %1549 = vmatprep.subr.bf16.mxu1 %v2173_v31 }
 0x718   :  { %v1260_v47 = vpop.f32.mrf.mxu1 }
 0x719   :  { %v2120_v48 = vpack.i.bf16 %v1260_v47, %v798_v23  ;;  %1550 = vmatpush1.bf16.msra.mxu1 %v2171_v32 }
 0x71a   :  { %v2082_v49 = vpop.f32.mrf.mxu1  ;;  %1551 = vmatprep.subr.bf16.mxu1 %v2176_v34 }
 0x71b   :  { %2121 = vrot.lane.b32.xlu1 %v2120_v48, %s2258_s4 }
 0x71c   :  { %v1263_v50 = vpop.f32.mrf.mxu1 }
 0x71d   :  { %1552 = vmatpush1.bf16.msra.mxu1 %v2174_v33  ;;  %v1861_v50 = vld [vmem:[%s2800_s7] ss:$0 sm:$0xff] }
 0x71e   :  { %v2083_v51 = vpop.f32.mrf.mxu1  ;;  %1553 = vmatprep.subr.bf16.mxu1 %v2179_v35 }
 0x721   :  { %1554 = vmatpush1.bf16.msra.mxu1 %v2177_v36 }
 0x722   :  { %1555 = vmatprep.subr.bf16.mxu1 %v2182_v37 }
 0x725   :  { %1556 = vmatpush1.bf16.msra.mxu1 %v2180_v38 }
 0x726   :  { %1557 = vmatprep.subr.bf16.mxu1 %v2185_v15 }
 0x729   :  { %1558 = vmatpush1.bf16.msra.mxu1 %v2183_v39 }
 0x72a   :  { %1559 = vmatprep.subr.bf16.mxu1 %v2188_v40 }
 0x72d   :  { %1560 = vmatpush1.bf16.msra.mxu1 %v2186_v41 }
 0x779   :  { %v2112_v52 = vpop.permute.xlu1 %2111 }
 0x77a   :  { %v2114_v53 = vunpack.i.h.bf16 %v2112_v52  ;;  %v2113_v56 = vunpack.i.l.bf16 %v2112_v52 }
 0x77c   :  { %v1278_v60 = vsel %vm353_vm1, %v924_v28, %v2114_v53  ;;  %v816_v62 = vsel %vm353_vm1, %v2521_v61, %v2113_v56  ;;  %v1862_v53 = vld [vmem:[%s2801_s8] ss:$0 sm:$0xff] }
 0x783   :  { %v2117_v3 = vpop.permute.xlu1 %2116 }
 0x784   :  { %v2119_v57 = vunpack.i.h.bf16 %v2117_v3  ;;  %v2118_v58 = vunpack.i.l.bf16 %v2117_v3 }
 0x786   :  { %v1279_v2 = vsel %vm817_vm5, %v1278_v60, %v2119_v57  ;;  %v818_v5 = vsel %vm817_vm5, %v816_v62, %v2118_v58  ;;  %v2189_v60 = vld [vmem:[%s2802_s11 + $0x78] sm:$0xff]  }
 0x787   :  { %v2190_v62 = vld [vmem:[%s2802_s11 + $0x38] sm:$0xff]   ;;  %1946 = vmatprep.subr.bf16.mxu0 %v2189_v60 }
 0x78d   :  { %v2122_v59 = vpop.permute.xlu1 %2121 }
 0x78e   :  { %v2124_v0 = vunpack.i.h.bf16 %v2122_v59  ;;  %v2123_v1 = vunpack.i.l.bf16 %v2122_v59 }
 0x790   :  { %v1280_v18 = vsel %vm819_vm6, %v1279_v2, %v2124_v0  ;;  %v820_v6 = vsel %vm819_vm6, %v818_v5, %v2123_v1  ;;  %v2191_v0 = vld [vmem:[%s2802_s11 + $0x70] sm:$0xff]   ;;  %v2193_v2 = vld [vmem:[%s2802_s11 + $0x68] sm:$0xff]  }
 0x791   :  { %v1281_v7 = vpack.c.bf16 %v1280_v18, %v820_v6  ;;  %v2192_v1 = vld [vmem:[%s2802_s11 + $0x30] sm:$0xff]   ;;  %v2194_v5 = vld [vmem:[%s2802_s11 + $0x28] sm:$0xff]   ;;  %v2195_v18 = vld [vmem:[%s2802_s11 + $0x60] sm:$0xff]  }
 0x792   :  { %v2196_v6 = vld [vmem:[%s2802_s11 + $0x20] sm:$0xff]  }
 0x793   :  { %2101 = vmatmul.mubr.bf16.vlgmr.msra.gmra.mxu0 %v1281_v7  ;;  %v2197_v7 = vld [vmem:[%s2802_s11 + $0x58] sm:$0xff]  }
 0x794   :  { %1947 = vmatpush3.bf16.msra.mxu0 %v2190_v62 }
 0x795   :  { %1948 = vmatprep.subr.bf16.mxu0 %v2191_v0 }
 0x798   :  { %1949 = vmatpush3.bf16.msra.mxu0 %v2192_v1 }
 0x799   :  { %1950 = vmatprep.subr.bf16.mxu0 %v2193_v2  ;;  %v1879_v2 = vld [vmem:[%s2804_s12] ss:$0 sm:$0xff] }
 0x79c   :  { %1951 = vmatpush3.bf16.msra.mxu0 %v2194_v5 }
 0x79d   :  { %1952 = vmatprep.subr.bf16.mxu0 %v2195_v18 }
 0x7a0   :  { %1953 = vmatpush3.bf16.msra.mxu0 %v2196_v6 }
 0x7a1   :  { %1954 = vmatprep.subr.bf16.mxu0 %v2197_v7 }
 0x853   :  { %v1387_v8 = vpop.f32.mrf.mxu0 }
 0x854   :  { %v1388_v9 = vadd.f32 %v1852_v63, %v1387_v8  ;;  %v2199_v8 = vld [vmem:[%s2802_s11 + $0x50] sm:$0xff]  }
 0x855   :  { %v2102_v10 = vpop.f32.mrf.mxu0 }
 0x856   :  { %v2661_v61 = vadd.f32 %v2253_v11, %v1388_v9  ;;  %v2200_v9 = vld [vmem:[%s2802_s11 + $0x10] sm:$0xff]   ;;  %v2201_v10 = vld [vmem:[%s2802_s11 + $0x48] sm:$0xff]  }
 0x857   :  { %v1390_v12 = vpop.f32.mrf.mxu0  ;;  %v2202_v11 = vld [vmem:[%s2802_s11 + $0x8] sm:$0xff]  }
 0x858   :  { %v1391_v13 = vadd.f32 %v1852_v63, %v1390_v12  ;;  %1398 = vadd.xlane.f32.xlu1 %v2661_v61  ;;  %v2198_v63 = vld [vmem:[%s2802_s11 + $0x18] sm:$0xff]   ;;  %v2203_v12 = vld [vmem:[%s2802_s11 + $0x40] sm:$0xff]  }
 0x859   :  { %v2103_v14 = vpop.f32.mrf.mxu0  ;;  %1955 = vmatpush3.bf16.msra.mxu0 %v2198_v63 }
 0x85a   :  { %v2667_v17 = vadd.f32 %v2254_v16, %v1391_v13  ;;  %1956 = vmatprep.subr.bf16.mxu0 %v2199_v8  ;;  %v2204_v13 = vld [vmem:[%s2802_s11] sm:$0xff]  }
 0x85b   :  { %v1453_v14 = vld [vmem:[%s2803_s10] sm:$0x3] }
 0x85c   :  { %1400 = vadd.xlane.f32.xlu0 %v2667_v17  ;;  %v1458_v16 = vrot.slane %v1453_v14, %v125_v4  ;;  %v1462_v19 = vrot.slane %v1453_v14, %v129_v55 }
 0x85d   :  { %1957 = vmatpush3.bf16.msra.mxu0 %v2200_v9 }
 0x85e   :  { %1958 = vmatprep.subr.bf16.mxu0 %v2201_v10 }
 0x861   :  { %1959 = vmatpush3.bf16.msra.mxu0 %v2202_v11 }
 0x862   :  { %1960 = vmatprep.subr.bf16.mxu0 %v2203_v12 }
 0x865   :  { %1961 = vmatpush3.bf16.msra.mxu0 %v2204_v13 }
 0x8e1   :  { %v1399_v27 = vpop.xlane.xlu1 %1398 }
 0x8e2   :  { %v1402_v21 = vmul.f32 0.0078125, %v1399_v27 }
 0x8e4   :  { %v1404_v22 = vsub.f32 %v2661_v61, %v1402_v21 }
 0x8e5   :  { %v1401_v23 = vpop.xlane.xlu0 %1400 }
 0x8e6   :  { %v1403_v24 = vmul.f32 0.0078125, %v1401_v23  ;;  %v1406_v25 = vmul.f32 %v1404_v22, %v1404_v22 }
 0x8e8   :  { %v1405_v26 = vsub.f32 %v2667_v17, %v1403_v24  ;;  %1408 = vadd.xlane.f32.xlu0 %v1406_v25 }
 0x8ea   :  { %v1407_v28 = vmul.f32 %v1405_v26, %v1405_v26 }
 0x8ec   :  { %1410 = vadd.xlane.f32.xlu0 %v1407_v28 }
 0x971   :  { %v1409_v42 = vpop.xlane.xlu0 %1408 }
 0x972   :  { %v1412_v43 = vmul.f32 0.0078125, %v1409_v42 }
 0x974   :  { %v1414_v44 = vadd.f32 1e-05, %v1412_v43 }
 0x975   :  { %v1411_v45 = vpop.xlane.xlu0 %1410 }
 0x976   :  { %2241 = vrsqrt.f32 %v1414_v44  ;;  %v1413_v46 = vmul.f32 0.0078125, %v1411_v45 }
 0x978   :  { %v1415_v47 = vadd.f32 1e-05, %v1413_v46 }
 0x97a   :  { %2243 = vrsqrt.f32 %v1415_v47 }
 0x983   :  { %v2242_v48 = vpop.eup %2241 }
 0x984   :  { %v1418_v49 = vmul.f32 %v2242_v48, %v1404_v22 }
 0x986   :  { %v1426_v3 = vmul.f32 %v1861_v50, %v1418_v49 }
 0x987   :  { %v2244_v51 = vpop.eup %2243 }
 0x988   :  { %v1419_v52 = vmul.f32 %v2244_v51, %v1405_v26  ;;  %v1434_v57 = vadd.f32 %v1862_v53, %v1426_v3 }
 0x98a   :  { %v1427_v56 = vmul.f32 %v1861_v50, %v1419_v52 }
 0x98c   :  { %v1435_v58 = vadd.f32 %v1862_v53, %v1427_v56 }
 0x98e   :  { %v1436_v59 = vpack.c.bf16 %v1435_v58, %v1434_v57 }
 0x990   :  { %1578 = vmatmul.mubr.bf16.vlgmr.msra.gmra.mxu1 %v1436_v59 }
 0xa50   :  { %v1579_v20 = vpop.f32.mrf.mxu1 }
 0xa51   :  { %v1580_v27 = vadd.f32 %v1579_v20, %v1458_v16 }
 0xa52   :  { %v1581_v21 = vpop.f32.mrf.mxu1 }
 0xa53   :  { %v1592_v22 = vmul.f32 0.044715, %v1580_v27  ;;  %v1582_v23 = vadd.f32 %v1581_v21, %v1462_v19  ;;  %v1588_v56 = vmul.f32 0.5, %v1580_v27 }
 0xa54   :  { %v1583_v24 = vpop.f32.mrf.mxu1 }
 0xa55   :  { %v1596_v25 = vmul.f32 %v1592_v22, %v1580_v27  ;;  %v1593_v26 = vmul.f32 0.044715, %v1582_v23  ;;  %v1584_v28 = vadd.f32 %v1583_v24, %v1458_v16  ;;  %v1589_v52 = vmul.f32 0.5, %v1582_v23 }
 0xa56   :  { %v1585_v29 = vpop.f32.mrf.mxu1 }
 0xa57   :  { %v1600_v30 = vmul.f32 %v1596_v25, %v1580_v27  ;;  %v1597_v31 = vmul.f32 %v1593_v26, %v1582_v23  ;;  %v1594_v32 = vmul.f32 0.044715, %v1584_v28  ;;  %v1586_v33 = vadd.f32 %v1585_v29, %v1462_v19 }
 0xa58   :  { %v1590_v50 = vmul.f32 0.5, %v1584_v28 }
 0xa59   :  { %v1604_v34 = vadd.f32 %v1600_v30, %v1580_v27  ;;  %v1601_v35 = vmul.f32 %v1597_v31, %v1582_v23  ;;  %v1598_v4 = vmul.f32 %v1594_v32, %v1584_v28  ;;  %v1595_v36 = vmul.f32 0.044715, %v1586_v33 }
 0xa5a   :  { %v1591_v3 = vmul.f32 0.5, %v1586_v33 }
 0xa5b   :  { %v1602_v54 = vmul.f32 %v1598_v4, %v1584_v28  ;;  %v1599_v55 = vmul.f32 %v1595_v36, %v1586_v33  ;;  %v1605_v37 = vadd.f32 %v1601_v35, %v1582_v23  ;;  %v1608_v38 = vmul.f32 0.7978846, %v1604_v34 }
 0xa5d   :  { %v1606_v15 = vadd.f32 %v1602_v54, %v1584_v28  ;;  %v1603_v39 = vmul.f32 %v1599_v55, %v1586_v33  ;;  %v1609_v40 = vmul.f32 0.7978846, %v1605_v37 }
 0xa5f   :  { %v1610_v41 = vmul.f32 0.7978846, %v1606_v15  ;;  %v1607_v42 = vadd.f32 %v1603_v39, %v1586_v33  ;;  %2245 = vtanh.f32 %v1609_v40 }
 0xa60   :  { %2247 = vtanh.f32 %v1608_v38 }
 0xa61   :  { %2249 = vtanh.f32 %v1610_v41  ;;  %v1611_v43 = vmul.f32 0.7978846, %v1607_v42 }
 0xa63   :  { %2251 = vtanh.f32 %v1611_v43 }
 0xa6c   :  { %v2246_v44 = vpop.eup %2245 }
 0xa6d   :  { %v2248_v45 = vpop.eup %2247  ;;  %v1617_v47 = vadd.f32 1.0, %v2246_v44 }
 0xa6e   :  { %v2250_v46 = vpop.eup %2249  ;;  %v1616_v51 = vadd.f32 1.0, %v2248_v45 }
 0xa6f   :  { %v1618_v48 = vadd.f32 1.0, %v2250_v46  ;;  %v1621_v58 = vmul.f32 %v1617_v47, %v1589_v52 }
 0xa70   :  { %v2252_v49 = vpop.eup %2251  ;;  %v1620_v60 = vmul.f32 %v1616_v51, %v1588_v56 }
 0xa71   :  { %v1619_v53 = vadd.f32 1.0, %v2252_v49  ;;  %v1622_v57 = vmul.f32 %v1618_v48, %v1590_v50 }
 0xa73   :  { %v1623_v59 = vmul.f32 %v1619_v53, %v1591_v3  ;;  %v1624_v0 = vpack.c.bf16 %v1622_v57, %v1620_v60 }
 0xa75   :  { %v1625_v62 = vpack.c.bf16 %v1623_v59, %v1621_v58 }
 0xa77   :  { %1793 = vmatprep.mubr.bf16.mxu0 %v1625_v62 }
 0xa78   :  { %1794 = vmatmul.mubr.bf16.vlgmr.msra.gmra.mxu0 %v1624_v0 }
 0xb38   :  { %v1962_v1 = vpop.f32.mrf.mxu0 }
 0xb3a   :  { %v1963_v5 = vpop.f32.mrf.mxu0 }
 0xb3b   :  { %v1964_v18 = vadd.f32 %v1963_v5, %v1962_v1 }
 0xb3c   :  { %v1965_v6 = vpop.f32.mrf.mxu0 }
 0xb3d   :  { %v1796_v7 = vadd.f32 %v1964_v18, %v1879_v2 }
 0xb3e   :  { %v1966_v63 = vpop.f32.mrf.mxu0 }
 0xb3f   :  { %v1802_v8 = vadd.f32 %v1796_v7, %v2661_v61  ;;  %v1967_v9 = vadd.f32 %v1966_v63, %v1965_v6 }
 0xb41   :  { %1804 = vst [vmem:[%s2805_s13] sm:$0xff] %v1802_v8  ;;  %v1799_v10 = vadd.f32 %v1967_v9, %v1879_v2 }
 0xb43   :  { %v1803_v11 = vadd.f32 %v1799_v10, %v2667_v17 }
 0xb45   :  { %1805 = vst [vmem:[%s2805_s13 + $0x8] sm:$0xff] %v1803_v11 }

</bundles_post_ra>
